<compile_context>
chip_gen: v5e
topology: v5e:2x2
jax: 0.10.0
libtpu: 0.0.40
codegen_flags: <defaults>
</compile_context>

<pallas_src>
import jax
import jax.numpy as jnp
from jax.experimental import pallas as pl
from jax.experimental.pallas import tpu as pltpu

EPS = 1e-6


def expert_layernorm_kernel(x_ref, w_ref, b_ref, o_ref):
    # x_ref / o_ref: (TILE_E, TILE_N, D);  w_ref / b_ref: (TILE_E, D).
    x = x_ref[...].astype(jnp.float32)
    mean = jnp.mean(x, axis=-1, keepdims=True)
    xc = x - mean
    # torch.std(unbiased=False) == sqrt(mean((x - mean)^2)); keep the two-pass
    # form and the (std + eps) denominator -- do NOT fold into rsqrt(var + eps).
    var = jnp.mean(xc * xc, axis=-1, keepdims=True)
    # One exact reciprocal per row (EUP path) instead of D divides per row.
    inv = pl.reciprocal(jnp.sqrt(var) + EPS, approx=False)
    w = w_ref[...].astype(jnp.float32)[:, None, :]    # (TILE_E, 1, D)
    b = b_ref[...].astype(jnp.float32)[:, None, :]
    # Single fused store (important on v5e's single vst slot).
    o_ref[...] = ((xc * inv) * w + b).astype(o_ref.dtype)


def _pick_tile_n(n, d, itemsize, target_bytes):
    """Largest slot-tile that divides N, is a multiple of 8, and keeps one
    (TILE_N, D) slab at roughly `target_bytes`."""
    if n % 8 != 0:
        return n  # full extent is always a legal block size
    max_rows = max(8, target_bytes // max(1, d * itemsize))
    tile = min(n, (max_rows // 8) * 8)
    tile = max(tile, 8)
    while n % tile != 0:
        tile -= 8
    return tile


def _pick_tile_e(e, n, d, itemsize, target_bytes):
    """Expert-tile used only when the whole slot dim fits in a block: either
    all experts, or a multiple of 8 that divides E (keeps the (TILE_E, D)
    weight block sublane-aligned), else 1."""
    max_te = target_bytes // max(1, n * d * itemsize)
    if max_te >= e:
        return e
    te = (max_te // 8) * 8
    while te >= 8:
        if e % te == 0:
            return te
        te -= 8
    return 1


def expert_layernorm(x, norm_weight, norm_bias, *, block_target_bytes=2 * 1024 * 1024):
    B, E, N, D = x.shape
    assert norm_weight.shape == (E, D)
    assert norm_bias.shape == (E, D)

    itemsize = jnp.dtype(x.dtype).itemsize
    tile_n = _pick_tile_n(N, D, itemsize, block_target_bytes)
    tile_e = (_pick_tile_e(E, N, D, itemsize, block_target_bytes)
              if tile_n == N else 1)
    grid = (B, E // tile_e, N // tile_n)

    cost = pl.CostEstimate(
        flops=7 * B * E * N * D,
        transcendentals=2 * B * E * N,
        bytes_accessed=2 * B * E * N * D * itemsize + 2 * E * D * itemsize,
    )

    return pl.pallas_call(
        expert_layernorm_kernel,
        out_shape=jax.ShapeDtypeStruct((B, E, N, D), x.dtype),
        grid_spec=pltpu.PrefetchScalarGridSpec(
            num_scalar_prefetch=0,
            grid=grid,
            in_specs=[
                # x: lane-dense (tile_e, tile_n, D) block; B dim squeezed out.
                pl.BlockSpec((None, tile_e, tile_n, D),
                             lambda b, e, n: (b, e, n, 0)),
                # weight/bias: only the current expert tile; index constant in
                # b and n so it stays resident across those grid axes.
                pl.BlockSpec((tile_e, D), lambda b, e, n: (e, 0)),
                pl.BlockSpec((tile_e, D), lambda b, e, n: (e, 0)),
            ],
            out_specs=pl.BlockSpec((None, tile_e, tile_n, D),
                                   lambda b, e, n: (b, e, n, 0)),
        ),
        compiler_params=pltpu.CompilerParams(
            # All axes independent -> megacore sharding even for B=1 on v7x.
            dimension_semantics=("parallel", "parallel", "parallel"),
        ),
        cost_estimate=cost,
    )(x, norm_weight, norm_bias)


def expert_layernorm_ref(x, norm_weight, norm_bias):
    xf = x.astype(jnp.float32)
    mean = jnp.mean(xf, axis=-1, keepdims=True)
    std = jnp.sqrt(jnp.mean((xf - mean) ** 2, axis=-1, keepdims=True))
    xn = (xf - mean) / (std + EPS)
    w = norm_weight.astype(jnp.float32)[None, :, None, :]
    b = norm_bias.astype(jnp.float32)[None, :, None, :]
    return (xn * w + b).astype(x.dtype)


if __name__ == "__main__":
    B, E, N, D = 2, 8, 16, 256   # batch, experts, slots per expert, hidden dim

    key = jax.random.PRNGKey(0)
    kx, kw, kb = jax.random.split(key, 3)
    x = jax.random.normal(kx, (B, E, N, D), dtype=jnp.float32)
    norm_weight = 1.0 + 0.1 * jax.random.normal(kw, (E, D), dtype=jnp.float32)
    norm_bias = 0.1 * jax.random.normal(kb, (E, D), dtype=jnp.float32)

    ref = expert_layernorm_ref(x, norm_weight, norm_bias)

    # Default tiling: whole (E, N, D) slab per batch fits one block -> grid (B,1,1).
    out = jax.block_until_ready(expert_layernorm(x, norm_weight, norm_bias))
    assert out.shape == ref.shape and out.dtype == ref.dtype
    assert jnp.allclose(out, ref, atol=1e-5, rtol=1e-5), "mismatch vs reference"

    # Force slot-dim tiling (TILE_E=1, TILE_N=8 -> grid (B, E, 2)).
    out_n = jax.block_until_ready(
        expert_layernorm(x, norm_weight, norm_bias, block_target_bytes=8 * D * 4)
    )
    assert jnp.allclose(out_n, ref, atol=1e-5, rtol=1e-5), "mismatch (N-tiled)"

    # Exercise sublane-aligned expert tiling (TILE_E=8 < E) at a second small shape.
    B2, E2, N2, D2 = 1, 16, 8, 128
    x2 = jax.random.normal(kx, (B2, E2, N2, D2), dtype=jnp.float32)
    w2 = 1.0 + 0.1 * jax.random.normal(kw, (E2, D2), dtype=jnp.float32)
    b2 = 0.1 * jax.random.normal(kb, (E2, D2), dtype=jnp.float32)
    ref2 = expert_layernorm_ref(x2, w2, b2)
    out2 = jax.block_until_ready(
        expert_layernorm(x2, w2, b2, block_target_bytes=8 * N2 * D2 * 4)
    )
    assert jnp.allclose(out2, ref2, atol=1e-5, rtol=1e-5), "mismatch (E-tiled)"

    print("KERNEL_OK")
</pallas_src>

<mosaic_0001>
module attributes {stable_mosaic.version = 11 : i64} {
  func.func @expert_layernorm_kernel(%arg0: i32, %arg1: i32, %arg2: i32, %arg3: memref<1x8x16x256xf32, #tpu.memory_space<vmem>>, %arg4: memref<8x256xf32, #tpu.memory_space<vmem>>, %arg5: memref<8x256xf32, #tpu.memory_space<vmem>>, %arg6: memref<1x8x16x256xf32, #tpu.memory_space<vmem>>) attributes {dimension_semantics = [#tpu.dimension_semantics<parallel>, #tpu.dimension_semantics<parallel>, #tpu.dimension_semantics<parallel>], iteration_bounds = array<i64: 2, 1, 1>, scalar_prefetch = 0 : i64, scratch_operands = 0 : i64, tpu.core_type = #tpu.core_type<tc>, window_params = [{transform_indices = @transform_0, window_bounds = array<i64: 1, 8, 16, 256>}, {transform_indices = @transform_1, window_bounds = array<i64: 8, 256>}, {transform_indices = @transform_2, window_bounds = array<i64: 8, 256>}, {transform_indices = @transform_3, window_bounds = array<i64: 1, 8, 16, 256>}]} {
    %c0 = arith.constant 0 : index
    %c0_0 = arith.constant 0 : index
    %c0_1 = arith.constant 0 : index
    %c0_2 = arith.constant 0 : index
    %0 = vector.load %arg3[%c0, %c0_0, %c0_1, %c0_2] : memref<1x8x16x256xf32, #tpu.memory_space<vmem>>, vector<1x8x16x256xf32>
    %1 = vector.shape_cast %0 : vector<1x8x16x256xf32> to vector<8x16x256xf32>
    %cst = arith.constant dense<0.000000e+00> : vector<8x16xf32>
    %2 = vector.multi_reduction <add>, %1, %cst [2] : vector<8x16x256xf32> to vector<8x16xf32>
    %3 = vector.shape_cast %2 : vector<8x16xf32> to vector<8x16x1xf32>
    %cst_3 = arith.constant 2.560000e+02 : f32
    %4 = vector.broadcast %cst_3 : f32 to vector<8x16x1xf32>
    %5 = arith.divf %3, %4 : vector<8x16x1xf32>
    %6 = vector.broadcast %5 : vector<8x16x1xf32> to vector<8x16x256xf32>
    %7 = arith.subf %1, %6 : vector<8x16x256xf32>
    %8 = arith.mulf %7, %7 : vector<8x16x256xf32>
    %cst_4 = arith.constant dense<0.000000e+00> : vector<8x16xf32>
    %9 = vector.multi_reduction <add>, %8, %cst_4 [2] : vector<8x16x256xf32> to vector<8x16xf32>
    %10 = vector.shape_cast %9 : vector<8x16xf32> to vector<8x16x1xf32>
    %cst_5 = arith.constant 2.560000e+02 : f32
    %11 = vector.broadcast %cst_5 : f32 to vector<8x16x1xf32>
    %12 = arith.divf %10, %11 : vector<8x16x1xf32>
    %13 = math.sqrt %12 : vector<8x16x1xf32>
    %cst_6 = arith.constant 9.99999997E-7 : f32
    %14 = vector.broadcast %cst_6 : f32 to vector<8x16x1xf32>
    %15 = arith.addf %13, %14 : vector<8x16x1xf32>
    %16 = tpu.reciprocal %15 : vector<8x16x1xf32> -> vector<8x16x1xf32>
    %c0_7 = arith.constant 0 : index
    %c0_8 = arith.constant 0 : index
    %17 = vector.load %arg4[%c0_7, %c0_8] : memref<8x256xf32, #tpu.memory_space<vmem>>, vector<8x256xf32>
    %18 = vector.shape_cast %17 : vector<8x256xf32> to vector<8x1x256xf32>
    %c0_9 = arith.constant 0 : index
    %c0_10 = arith.constant 0 : index
    %19 = vector.load %arg5[%c0_9, %c0_10] : memref<8x256xf32, #tpu.memory_space<vmem>>, vector<8x256xf32>
    %20 = vector.shape_cast %19 : vector<8x256xf32> to vector<8x1x256xf32>
    %21 = vector.broadcast %16 : vector<8x16x1xf32> to vector<8x16x256xf32>
    %22 = arith.mulf %7, %21 : vector<8x16x256xf32>
    %23 = vector.broadcast %18 : vector<8x1x256xf32> to vector<8x16x256xf32>
    %24 = arith.mulf %22, %23 : vector<8x16x256xf32>
    %25 = vector.broadcast %20 : vector<8x1x256xf32> to vector<8x16x256xf32>
    %26 = arith.addf %24, %25 : vector<8x16x256xf32>
    %c0_11 = arith.constant 0 : index
    %c0_12 = arith.constant 0 : index
    %c0_13 = arith.constant 0 : index
    %c0_14 = arith.constant 0 : index
    %27 = vector.load %arg6[%c0_11, %c0_12, %c0_13, %c0_14] : memref<1x8x16x256xf32, #tpu.memory_space<vmem>>, vector<1x8x16x256xf32>
    %28 = vector.shape_cast %27 : vector<1x8x16x256xf32> to vector<8x16x256xf32>
    %29 = vector.shape_cast %26 : vector<8x16x256xf32> to vector<1x8x16x256xf32>
    tpu.vector_store %arg6[%c0_11, %c0_12, %c0_13, %c0_14], %29 {strides = array<i32>} : memref<1x8x16x256xf32, #tpu.memory_space<vmem>>, vector<1x8x16x256xf32>,
    return
  }
  func.func @transform_0(%arg0: i32, %arg1: i32, %arg2: i32) -> (i32, i32, i32, i32) {
    %c0_i32 = arith.constant 0 : i32
    %c0_i32_0 = arith.constant 0 : i32
    return %arg0, %arg1, %arg2, %c0_i32 : i32, i32, i32, i32
  }
  func.func @transform_1(%arg0: i32, %arg1: i32, %arg2: i32) -> (i32, i32) {
    %c0_i32 = arith.constant 0 : i32
    %c0_i32_0 = arith.constant 0 : i32
    return %arg1, %c0_i32 : i32, i32
  }
  func.func @transform_2(%arg0: i32, %arg1: i32, %arg2: i32) -> (i32, i32) {
    %c0_i32 = arith.constant 0 : i32
    %c0_i32_0 = arith.constant 0 : i32
    return %arg1, %c0_i32 : i32, i32
  }
  func.func @transform_3(%arg0: i32, %arg1: i32, %arg2: i32) -> (i32, i32, i32, i32) {
    %c0_i32 = arith.constant 0 : i32
    %c0_i32_0 = arith.constant 0 : i32
    return %arg0, %arg1, %arg2, %c0_i32 : i32, i32, i32, i32
  }
}

</mosaic_0001>

<bundles_post_ra>
// kernel: tpu_custom_call.1
= control target key start
LH: loop header
LB: loop body
LE: loop exit
PB: predicated region body
PF: predicated region fallthrough
CT: control target
= control target key end

     0   :  { %s2765_s0 = inlined_call_operand.hbm [shape: f32[2,8,16,256], index: 0, kind: input, shape index: {}]   ;;  %s2766_s1 = inlined_call_operand.hbm [shape: f32[8,256], index: 1, kind: input, shape index: {}]   ;;  %s2767_s2 = inlined_call_operand.hbm [shape: f32[8,256], index: 2, kind: input, shape index: {}]   ;;  %s2768_s3 = inlined_call_operand.hbm [shape: f32[2,8,16,256], index: 3, kind: output, shape index: {}]  }
   0x1   :  { %2782 = sst [smem:[#allocation25_spill]] %s2766_s1 }
   0x2   :  { %8 = vsyncpa [#allocation3], 0 }
   0x3   :  { %10 = vsyncpa [#allocation3 + $0x1], 0 }
   0x4   :  { %11 = vsyncpa [#allocation6], 0 }
   0x5   :  { %12 = vsyncpa [#allocation4], 0 }
   0x6   :  { %14 = vsyncpa [#allocation4 + $0x1], 0  ;;  %s1697_s12 = smov 0   ;;  %s1699_s13 = smov 0  }
   0x7   :  { %s1701_s14 = smov 0   ;;  %s1703_s15 = smov 0  }
   0x8   :  { %s1705_s16 = smov 0   ;;  %s1707_s17 = smov 0  }
   0x9 LB: > { %s1315_s18 = sadd.s32 4294967295, %s1668_s17   ;;  %s1316_s19 = sadd.s32 4294967294, %s1668_s17   ;;  %s1668_s17 = sphi %s1707_s17, %s20_s17   ;;  %s1664_s16 = sphi %s1705_s16, %s2837_s16   ;;  %s1660_s15 = sphi %s1703_s15, %s2836_s15   ;;  %s1656_s14 = sphi %s1701_s14, %s2835_s14   ;;  %s1652_s13 = sphi %s1699_s13, %s2834_s13   ;;  %s1648_s12 = sphi %s1697_s12, %s2833_s12  }
   0xa   : > { %s50_s20 = sadd.s32 1, %s1656_s14  ;;  %p57_p0 = scmp.ne.s32.totalorder %s1656_s14, %s1652_s13 }
   0xb   : > { %p58_p1 = scmp.eq.s32.totalorder %s1668_s17, 0  ;;  %p63_p2 = scmp.ne.s32.totalorder %s1652_s13, %s1648_s12 }
   0xc   : > { %p1735_p3 = scmp.eq.s32.totalorder %s1315_s18, 0  ;;  %p143_p4 = scmp.eq.s32.totalorder %s1315_s18, 1 }
   0xd   : > { %p1739_p5 = por %p58_p1, %p57_p0  ;;  %p149_p6 = scmp.eq.s32.totalorder %s1316_s19, 1 }
   0xe   : > { %p1745_p7 = por %p1735_p3, %p63_p2  ;;  %p1749_p8 = por %p143_p4, %p57_p0 }
   0xf   : > { %p1753_p9 = por %p149_p6, %p63_p2  ;;  %p1317_p10 = scmp.ge.s32.totalorder %s1668_s17, 1 }
  0x10   : > { %p156_p11 = scmp.lt.s32.totalorder %s1668_s17, 3  ;;  %s2788_s1 = sld [smem:[#allocation25_spill]] }
  0x11   : > { %s1670_s30 = smov [#allocation5]   ;;  %p1320_p13 = scmp.ge.s32.totalorder %s1668_s17, 2 }
  0x12   : > { %p1762_p12 = pnand %p1317_p10, %p156_p11  ;;  %s173_s4 = sshll.u32 %s1670_s30, 4  ;;  %s174_s4 = int_to_ptr.vmem [resolvable:$true] %s173_s4 }
  0x13   : > { %p1365_p1 = scmp.lt.s32.totalorder %s1668_s17, 2  ;;  %s186_s7 = sshll.u32 %s2767_s2, 4  ;;  %s187_s7 = int_to_ptr.hbm [resolvable:$true] %s186_s7 }
  0x14   : > { %p1348_p0 = pneg %p1762_p12  ;;  %s1671_s9 = smov [#allocation7]  }
  0x15   : > { %p1777_p4 = pnand %p1365_p1, %p1739_p5  ;;  %s188_s10 = sshll.u32 %s1671_s9, 4  ;;  %s189_s10 = int_to_ptr.vmem [resolvable:$true] %s188_s10 }
  0x16   : > { %s171_s28 = sshll.u32 %s2788_s1, 4  ;;  %p1349_p2 = pnand %p1348_p0, %p1735_p3  ;;  %s172_s28 = int_to_ptr.hbm [resolvable:$true] %s171_s28 }
  0x17   : > { %s199_s11 = sand.u32 1, %s1656_s14   ;;  %s39_s18 = sadd.s32 1, %s1664_s16 }
  0x18   : > { %1351 = dma.hbm_to_vmem [thread:$0]  (!%p1349_p2), %s172_s28, 256, %s174_s4, [#allocation6]  }
  0x19   : > { %1354 = dma.hbm_to_vmem [thread:$0]  (!%p1349_p2), %s187_s7, 256, %s189_s10, [#allocation6]  }
  0x1a   : > { %s1321_s19 = sshll.u32 %s199_s11, 8  ;;  %p41_p6 = scmp.ge.s32.totalorder %s39_s18, 2 }
  0x1b   : > { %s1334_s26 = sshll.u32 %s1664_s16, 8  ;;  %s203_s27 = scalar_lea.vmem [#allocation2], %s1321_s19 }
  0x1c   : > { %s217_s22 = sshll.u32 %s203_s27, 4  ;;  %s2839_s18 = smov (%p41_p6, %s39_s18), 0  ;;  %s218_s22 = int_to_ptr.vmem [resolvable:$true] %s217_s22 }
  0x1d   : > { %s214_s6 = scalar_lea.hbm %s2765_s0, %s1334_s26  ;;  %s43_s28 = ssub.s32 %s1664_s16, %s2839_s18 }
  0x1e   : > { %s215_s4 = sshll.u32 %s214_s6, 4  ;;  %p48_p5 = scmp.eq.s32.totalorder %s43_s28, 0  ;;  %s216_s4 = int_to_ptr.hbm [resolvable:$true] %s215_s4 }
  0x1f   : > { %s200_s9 = scalar_lea.sflag [#allocation3], %s199_s11  ;;  %s1672_s10 = smov 256  }
  0x20   : > { %s1794_s7 = scalar_select %p48_p5, %s1656_s14, %s50_s20  }
  0x21   : > { %s1673_s1 = smov 16   ;;  %229 = sbr.rel (%p1762_p12) target bundleno = 467 (0x1d3), region = 32 }
  0x22   : > { %1358 = dma.hbm_to_vmem [thread:$0]  (!%p1777_p4), %s216_s4, 4096, %s218_s22, %s200_s9, %s1672_s10, %s1672_s10, %s1673_s1  }
  0x26   : > { %s1801_s19 = sand.u32 1, %s1652_s13  }
  0x27   : > { %s1325_s26 = sshll.u32 %s1801_s19, 8  ;;  %s232_s27 = scalar_lea.sflag [#allocation3], %s1801_s19 }
  0x28   : > { %s1807_s20 = scalar_lea.vmem [#allocation2], %s1325_s26 }
  0x29   : > { %1635 = dma.done.wait (%p1745_p7), %s232_s27, 4096  }
  0x2a   : > { %1637 = vsyncadd (%p1745_p7), %s232_s27, 4294963200 }
  0x2b   : > { %1639 = dma.done.wait (%p1735_p3), [#allocation6], 512  }
  0x2c   : > { %1641 = vsyncadd (%p1735_p3), [#allocation6], 4294966784  ;;  %v1818_v0 = vld [vmem:[%s1807_s20 + $0x40] sm:$0xff]  ;;  %v1821_v1 = vld [vmem:[%s1807_s20 + $0x48] sm:$0xff]  ;;  %v1674_v48 = vmov 256.0   ;;  %vm941_vm1 = vcmask 1040384  }
  0x2d   : > { %v1824_v2 = vld [vmem:[%s1807_s20 + $0x20] sm:$0xff]  ;;  %v317_v3 = vadd.f32 %v1821_v1, %v1818_v0  ;;  %v1829_v4 = vld [vmem:[%s1807_s20 + $0x28] sm:$0xff]  ;;  %v1842_v9 = vld [vmem:[%s1807_s20 + $0x50] sm:$0xff]  ;;  %1424 = vrcp.f32 %v1674_v48  ;;  %vm943_vm2 = vcmask 1041409   ;;  %vm946_vm8 = vcmask 1042434   ;;  %s2325_s1 = scalar_lea.vmem [#allocation8], %s1325_s26 }
  0x2e   : > { %v1832_v5 = vld [vmem:[%s1807_s20] sm:$0xff]  ;;  %v1835_v6 = vld [vmem:[%s1807_s20 + $0x8] sm:$0xff]  ;;  %v311_v7 = vadd.f32 %v1829_v4, %v1824_v2  ;;  %v1845_v10 = vld [vmem:[%s1807_s20 + $0x58] sm:$0xff]  ;;  %s1335_s21 = sshll.u32 %s1660_s15, 8  ;;  %s1195_s8 = sshll.u32 %s2325_s1, 4  ;;  %s1196_s8 = int_to_ptr.vmem [resolvable:$true] %s1195_s8 }
  0x2f   : > { %v305_v8 = vadd.f32 %v1835_v6, %v1832_v5  ;;  %318 = vadd.xlane.f32.xlu2 %v317_v3  ;;  %v1848_v11 = vld [vmem:[%s1807_s20 + $0x30] sm:$0xff]  ;;  %v1851_v12 = vld [vmem:[%s1807_s20 + $0x38] sm:$0xff]  ;;  %v320_v15 = vadd.f32 %v1845_v10, %v1842_v9  ;;  %v1866_v18 = vld [vmem:[%s1807_s20 + $0x80] sm:$0xff]  ;;  %s1194_s15 = scalar_lea.hbm %s2768_s3, %s1335_s21  ;;  %s1177_s22 = scalar_lea.sflag [#allocation4], %s1801_s19 }
  0x30   : > { %312 = vadd.xlane.f32.xlu1 %v311_v7  ;;  %v1854_v13 = vld [vmem:[%s1807_s20 + $0x10] sm:$0xff]  ;;  %v1857_v14 = vld [vmem:[%s1807_s20 + $0x18] sm:$0xff]  ;;  %v314_v16 = vadd.f32 %v1851_v12, %v1848_v11  ;;  %v1869_v19 = vld [vmem:[%s1807_s20 + $0x88] sm:$0xff]  ;;  %s1197_s11 = sshll.u32 %s1194_s15, 4  ;;  %s1602_s4 = scalar_lea.hbm %s2768_s3, 512  ;;  %s1198_s11 = int_to_ptr.hbm [resolvable:$true] %s1197_s11 }
  0x31   : > { %306 = vadd.xlane.f32.xlu0 %v305_v8  ;;  %v308_v17 = vadd.f32 %v1857_v14, %v1854_v13  ;;  %v1872_v20 = vld [vmem:[%s1807_s20 + $0x60] sm:$0xff]  ;;  %v1875_v21 = vld [vmem:[%s1807_s20 + $0x68] sm:$0xff]  ;;  %v1878_v22 = vld [vmem:[%s1807_s20 + $0x70] sm:$0xff]  ;;  %v329_v24 = vadd.f32 %v1869_v19, %v1866_v18  ;;  %s1596_s30 = sshra.s32 %s1198_s11, 4  ;;  %s1597_s30 = int_to_ptr.hbm [resolvable:$true] %s1596_s30 }
  0x32   : > { %v1881_v23 = vld [vmem:[%s1807_s20 + $0x78] sm:$0xff]  ;;  %v323_v25 = vadd.f32 %v1875_v21, %v1872_v20  ;;  %v1890_v27 = vld [vmem:[%s1807_s20 + $0xb0] sm:$0xff]  ;;  %v1902_v31 = vld [vmem:[%s1807_s20 + $0xa0] sm:$0xff]  ;;  %s1598_s5 = scalar_lea.hbm %s1597_s30, 256  ;;  %p1603_p11 = scmp.lt.s32.totalorder %s1597_s30, %s2768_s3 }
  0x33   : > { %v326_v26 = vadd.f32 %v1881_v23, %v1878_v22  ;;  %v1893_v28 = vld [vmem:[%s1807_s20 + $0xb8] sm:$0xff]  ;;  %v1896_v29 = vld [vmem:[%s1807_s20 + $0x90] sm:$0xff]  ;;  %v1905_v32 = vld [vmem:[%s1807_s20 + $0xa8] sm:$0xff]  ;;  %v1425_v49 = vpop.eup %1424  ;;  %p1599_p3 = scmp.ne.s32.totalorder %s1597_s30, %s1598_s5  ;;  %p1604_p12 = scmp.lt.s32.totalorder %s1602_s4, %s1598_s5 }
  0x34   : > { %v1899_v30 = vld [vmem:[%s1807_s20 + $0x98] sm:$0xff]  ;;  %v338_v33 = vadd.f32 %v1893_v28, %v1890_v27  ;;  %v335_v35 = vadd.f32 %v1905_v32, %v1902_v31  ;;  %v1914_v36 = vld [vmem:[%s1807_s20 + $0xe0] sm:$0xff]  ;;  %v1917_v37 = vld [vmem:[%s1807_s20 + $0xe8] sm:$0xff]  ;;  %v354_v50 = vmul.f32 256.0, %v1425_v49  ;;  %vm358_vm0 = vweird.f32 %v1425_v49 }
  0x35   : > { %v332_v34 = vadd.f32 %v1899_v30, %v1896_v29  ;;  %v1920_v38 = vld [vmem:[%s1807_s20 + $0xc0] sm:$0xff]  ;;  %v1923_v39 = vld [vmem:[%s1807_s20 + $0xc8] sm:$0xff]  ;;  %v1926_v40 = vld [vmem:[%s1807_s20 + $0xd0] sm:$0xff]  ;;  %v347_v42 = vadd.f32 %v1917_v37, %v1914_v36  ;;  %p1600_p7 = pnand %p1599_p3, %p1749_p8  ;;  %p1605_p0 = por %p1604_p12, %p1603_p11 }
  0x36   : > { %v1929_v41 = vld [vmem:[%s1807_s20 + $0xd8] sm:$0xff]  ;;  %v341_v43 = vadd.f32 %v1923_v39, %v1920_v38  ;;  %v1938_v45 = vld [vmem:[%s1807_s20 + $0xf0] sm:$0xff]  ;;  %v355_v51 = vsub.f32 1.0, %v354_v50 }
  0x37   : > { %321 = vadd.xlane.f32.xlu2 %v320_v15  ;;  %v344_v44 = vadd.f32 %v1929_v41, %v1926_v40  ;;  %v1941_v46 = vld [vmem:[%s1807_s20 + $0xf8] sm:$0xff]  ;;  %p1601_p10 = pneg %p1600_p7 }
  0x38   : > { %315 = vadd.xlane.f32.xlu1 %v314_v16  ;;  %v350_v47 = vadd.f32 %v1941_v46, %v1938_v45  ;;  %v356_v52 = vmul.f32 %v1425_v49, %v355_v51 }
  0x39   : > { %309 = vadd.xlane.f32.xlu0 %v308_v17  ;;  %p1606_p1 = pnand %p1605_p0, %p1601_p10 }
  0x3a   : > { %v357_v53 = vadd.f32 %v1425_v49, %v356_v52 }
  0x3c   : > { %v1945_v54 = vsel %vm358_vm0, %v1425_v49, %v357_v53 }
  0x3f   : > { %330 = vadd.xlane.f32.xlu2 %v329_v24 }
  0x40   : > { %327 = vadd.xlane.f32.xlu1 %v326_v26 }
  0x41   : > { %324 = vadd.xlane.f32.xlu0 %v323_v25 }
  0x47   : > { %339 = vadd.xlane.f32.xlu2 %v338_v33 }
  0x48   : > { %336 = vadd.xlane.f32.xlu1 %v335_v35 }
  0x49   : > { %333 = vadd.xlane.f32.xlu0 %v332_v34 }
  0x4f   : > { %348 = vadd.xlane.f32.xlu2 %v347_v42 }
  0x50   : > { %345 = vadd.xlane.f32.xlu1 %v344_v44 }
  0x51   : > { %342 = vadd.xlane.f32.xlu0 %v341_v43 }
  0x59   : > { %351 = vadd.xlane.f32.xlu0 %v350_v47 }
  0xa2   : > { %v319_v55 = vpop.xlane.xlu2 %318 }
  0xa3   : > { %v313_v56 = vpop.xlane.xlu1 %312  ;;  %v364_v44 = vmul.f32 %v1945_v54, %v319_v55 }
  0xa4   : > { %v307_v57 = vpop.xlane.xlu0 %306  ;;  %v362_v58 = vmul.f32 %v1945_v54, %v313_v56 }
  0xa5   : > { %v360_v59 = vmul.f32 %v1945_v54, %v307_v57  ;;  %v2004_v51 = vsub.f32 %v1818_v0, %v364_v44  ;;  %v2007_v52 = vsub.f32 %v1821_v1, %v364_v44 }
  0xa6   : > { %v1950_v60 = vsub.f32 %v1824_v2, %v362_v58  ;;  %v1953_v61 = vsub.f32 %v1829_v4, %v362_v58 }
  0xa7   : > { %v1956_v62 = vsub.f32 %v1832_v5, %v360_v59  ;;  %v1959_v63 = vsub.f32 %v1835_v6, %v360_v59 }
  0xa8   : > { %v412_v3 = vmul.f32 %v1950_v60, %v1950_v60  ;;  %v413_v7 = vmul.f32 %v1953_v61, %v1953_v61 }
  0xa9   : > { %v408_v8 = vmul.f32 %v1956_v62, %v1956_v62  ;;  %v409_v2 = vmul.f32 %v1959_v63, %v1959_v63 }
  0xaa   : > { %v322_v4 = vpop.xlane.xlu2 %321  ;;  %v446_v15 = vadd.f32 %v413_v7, %v412_v3 }
  0xab   : > { %v440_v16 = vadd.f32 %v409_v2, %v408_v8  ;;  %v365_v5 = vmul.f32 %v1945_v54, %v322_v4  ;;  %v316_v17 = vpop.xlane.xlu1 %315 }
  0xac   : > { %v310_v6 = vpop.xlane.xlu0 %309  ;;  %v363_v24 = vmul.f32 %v1945_v54, %v316_v17  ;;  %447 = vadd.xlane.f32.xlu0 %v446_v15 }
  0xad   : > { %v361_v25 = vmul.f32 %v1945_v54, %v310_v6  ;;  %441 = vadd.xlane.f32.xlu1 %v440_v16  ;;  %v1973_v26 = vsub.f32 %v1842_v9, %v365_v5  ;;  %v1976_v33 = vsub.f32 %v1845_v10, %v365_v5 }
  0xae   : > { %v1979_v34 = vsub.f32 %v1848_v11, %v363_v24  ;;  %v1982_v35 = vsub.f32 %v1851_v12, %v363_v24 }
  0xaf   : > { %v1985_v42 = vsub.f32 %v1854_v13, %v361_v25  ;;  %v1988_v43 = vsub.f32 %v1857_v14, %v361_v25  ;;  %v418_v9 = vmul.f32 %v1973_v26, %v1973_v26  ;;  %v419_v10 = vmul.f32 %v1976_v33, %v1976_v33 }
  0xb0   : > { %v414_v11 = vmul.f32 %v1979_v34, %v1979_v34  ;;  %v415_v12 = vmul.f32 %v1982_v35, %v1982_v35 }
  0xb1   : > { %v410_v13 = vmul.f32 %v1985_v42, %v1985_v42  ;;  %v411_v14 = vmul.f32 %v1988_v43, %v1988_v43  ;;  %v455_v47 = vadd.f32 %v419_v10, %v418_v9 }
  0xb2   : > { %v331_v48 = vpop.xlane.xlu2 %330  ;;  %v449_v49 = vadd.f32 %v415_v12, %v414_v11 }
  0xb3   : > { %v443_v50 = vadd.f32 %v411_v14, %v410_v13  ;;  %v368_v53 = vmul.f32 %v1945_v54, %v331_v48  ;;  %v328_v56 = vpop.xlane.xlu1 %327 }
  0xb4   : > { %v325_v55 = vpop.xlane.xlu0 %324  ;;  %456 = vadd.xlane.f32.xlu0 %v455_v47  ;;  %v367_v0 = vmul.f32 %v1945_v54, %v328_v56 }
  0xb5   : > { %v366_v57 = vmul.f32 %v1945_v54, %v325_v55  ;;  %450 = vadd.xlane.f32.xlu1 %v449_v49  ;;  %v2012_v58 = vsub.f32 %v1866_v18, %v368_v53  ;;  %v2015_v59 = vsub.f32 %v1869_v19, %v368_v53  ;;  %444 = vadd.xlane.f32.xlu2 %v443_v50 }
  0xb6   : > { %v416_v18 = vmul.f32 %v2004_v51, %v2004_v51  ;;  %v417_v19 = vmul.f32 %v2007_v52, %v2007_v52  ;;  %v2040_v4 = vsub.f32 %v1881_v23, %v367_v0 }
  0xb7   : > { %v2019_v1 = vsub.f32 %v1872_v20, %v366_v57  ;;  %v2022_v3 = vsub.f32 %v1875_v21, %v366_v57  ;;  %v424_v7 = vmul.f32 %v2012_v58, %v2012_v58  ;;  %v425_v8 = vmul.f32 %v2015_v59, %v2015_v59 }
  0xb8   : > { %v2037_v21 = vsub.f32 %v1878_v22, %v367_v0  ;;  %v452_v24 = vadd.f32 %v417_v19, %v416_v18  ;;  %v423_v11 = vmul.f32 %v2040_v4, %v2040_v4 }
  0xb9   : > { %v420_v2 = vmul.f32 %v2019_v1, %v2019_v1  ;;  %v421_v20 = vmul.f32 %v2022_v3, %v2022_v3  ;;  %v464_v15 = vadd.f32 %v425_v8, %v424_v7 }
  0xba   : > { %v340_v16 = vpop.xlane.xlu2 %339  ;;  %v422_v10 = vmul.f32 %v2037_v21, %v2037_v21 }
  0xbb   : > { %v458_v5 = vadd.f32 %v421_v20, %v420_v2  ;;  %v371_v17 = vmul.f32 %v1945_v54, %v340_v16  ;;  %v337_v25 = vpop.xlane.xlu1 %336 }
  0xbc   : > { %v334_v6 = vpop.xlane.xlu0 %333  ;;  %465 = vadd.xlane.f32.xlu0 %v464_v15  ;;  %v370_v9 = vmul.f32 %v1945_v54, %v337_v25  ;;  %v461_v49 = vadd.f32 %v423_v11, %v422_v10 }
  0xbd   : > { %v369_v44 = vmul.f32 %v1945_v54, %v334_v6  ;;  %459 = vadd.xlane.f32.xlu1 %v458_v5  ;;  %v2046_v22 = vsub.f32 %v1890_v27, %v371_v17  ;;  %v2049_v23 = vsub.f32 %v1893_v28, %v371_v17  ;;  %453 = vadd.xlane.f32.xlu2 %v452_v24 }
  0xbe   : > { %v2066_v14 = vsub.f32 %v1902_v31, %v370_v9 }
  0xbf   : > { %2791 = vst [vmem:[#allocation12_spill] sm:$0xff] %v2046_v22  ;;  %v2056_v12 = vsub.f32 %v1896_v29, %v369_v44  ;;  %v2059_v13 = vsub.f32 %v1899_v30, %v369_v44  ;;  %v430_v27 = vmul.f32 %v2046_v22, %v2046_v22  ;;  %v431_v28 = vmul.f32 %v2049_v23, %v2049_v23 }
  0xc0   : > { %2792 = vst [vmem:[#allocation13_spill] sm:$0xff] %v2049_v23  ;;  %v2073_v29 = vsub.f32 %v1905_v32, %v370_v9  ;;  %v428_v0 = vmul.f32 %v2066_v14, %v2066_v14 }
  0xc1   : > { %2793 = vst [vmem:[#allocation14_spill] sm:$0xff] %v2059_v13  ;;  %v426_v47 = vmul.f32 %v2056_v12, %v2056_v12  ;;  %v427_v48 = vmul.f32 %v2059_v13, %v2059_v13  ;;  %v473_v30 = vadd.f32 %v431_v28, %v430_v27 }
  0xc2   : > { %2794 = vst [vmem:[#allocation15_spill] sm:$0xff] %v2066_v14  ;;  %v349_v50 = vpop.xlane.xlu2 %348  ;;  %v429_v18 = vmul.f32 %v2073_v29, %v2073_v29 }
  0xc3   : > { %2795 = vst [vmem:[#allocation16_spill] sm:$0xff] %v2073_v29  ;;  %v467_v53 = vadd.f32 %v427_v48, %v426_v47  ;;  %v374_v55 = vmul.f32 %v1945_v54, %v349_v50  ;;  %v346_v57 = vpop.xlane.xlu1 %345  ;;  %v965_v50 = vld [vmem:[#allocation7 + $0x8] sm:$0xff] }
  0xc4   : > { %v343_v56 = vpop.xlane.xlu0 %342  ;;  %474 = vadd.xlane.f32.xlu0 %v473_v30  ;;  %v373_v8 = vmul.f32 %v1945_v54, %v346_v57  ;;  %v470_v5 = vadd.f32 %v429_v18, %v428_v0 }
  0xc5   : > { %v372_v31 = vmul.f32 %v1945_v54, %v343_v56  ;;  %468 = vadd.xlane.f32.xlu1 %v467_v53  ;;  %v2080_v7 = vsub.f32 %v1914_v36, %v374_v55  ;;  %v2083_v32 = vsub.f32 %v1917_v37, %v374_v55  ;;  %462 = vadd.xlane.f32.xlu2 %v461_v49 }
  0xc6   : > { %v2103_v16 = vsub.f32 %v1926_v40, %v373_v8 }
  0xc7   : > { %2796 = vst [vmem:[#allocation17_spill] sm:$0xff] %v2080_v7  ;;  %v2089_v19 = vsub.f32 %v1920_v38, %v372_v31  ;;  %v2092_v2 = vsub.f32 %v1923_v39, %v372_v31  ;;  %v436_v20 = vmul.f32 %v2080_v7, %v2080_v7  ;;  %v437_v36 = vmul.f32 %v2083_v32, %v2083_v32 }
  0xc8   : > { %2797 = vst [vmem:[#allocation18_spill] sm:$0xff] %v2083_v32  ;;  %v2106_v38 = vsub.f32 %v1929_v41, %v373_v8  ;;  %v434_v25 = vmul.f32 %v2103_v16, %v2103_v16 }
  0xc9   : > { %2798 = vst [vmem:[#allocation19_spill] sm:$0xff] %v2089_v19  ;;  %v432_v37 = vmul.f32 %v2089_v19, %v2089_v19  ;;  %v433_v15 = vmul.f32 %v2092_v2, %v2092_v2  ;;  %v482_v39 = vadd.f32 %v437_v36, %v436_v20  ;;  %v2142_v20 = vld [vmem:[#allocation5] sm:$0xff]  ;;  %v2144_v36 = vrot.slane %v965_v50, 7 }
  0xca   : > { %2799 = vst [vmem:[#allocation20_spill] sm:$0xff] %v2092_v2  ;;  %v435_v44 = vmul.f32 %v2106_v38, %v2106_v38 }
  0xcb   : > { %2800 = vst [vmem:[#allocation21_spill] sm:$0xff] %v2103_v16  ;;  %v476_v17 = vadd.f32 %v433_v15, %v432_v37 }
  0xcc   : > { %2801 = vst [vmem:[#allocation22_spill] sm:$0xff] %v2106_v38  ;;  %v352_v6 = vpop.xlane.xlu0 %351  ;;  %483 = vadd.xlane.f32.xlu0 %v482_v39  ;;  %v479_v11 = vadd.f32 %v435_v44, %v434_v25 }
  0xcd   : > { %v375_v24 = vmul.f32 %v1945_v54, %v352_v6  ;;  %477 = vadd.xlane.f32.xlu1 %v476_v17  ;;  %471 = vadd.xlane.f32.xlu2 %v470_v5  ;;  %v2153_v5 = vld [vmem:[#allocation7] sm:$0xff] }
  0xce   : > { %v2158_v6 = vsel %vm941_vm1, %v2153_v5, %v2144_v36  ;;  %v2239_v16 = vsel %vm946_vm8, %v2153_v5, %v2144_v36 }
  0xcf   : > { %v2114_v40 = vsub.f32 %v1938_v45, %v375_v24  ;;  %v2117_v41 = vsub.f32 %v1941_v46, %v375_v24  ;;  %v937_v46 = vld [vmem:[#allocation5 + $0x8] sm:$0xff] }
  0xd0   : > { %v2138_v8 = vrot.slane %v937_v46, 7 }
  0xd1   : > { %2802 = vst [vmem:[#allocation23_spill] sm:$0xff] %v2114_v40  ;;  %v438_v9 = vmul.f32 %v2114_v40, %v2114_v40  ;;  %v439_v10 = vmul.f32 %v2117_v41, %v2117_v41 }
  0xd2   : > { %2803 = vst [vmem:[#allocation24_spill] sm:$0xff] %v2117_v41  ;;  %v2151_v39 = vsel %vm941_vm1, %v2142_v20, %v2138_v8  ;;  %v944_v50 = vsel %vm943_vm2, %v2142_v20, %v2138_v8 }
  0xd3   : > { %v485_v27 = vadd.f32 %v439_v10, %v438_v9 }
  0xd5   : > { %486 = vadd.xlane.f32.xlu1 %v485_v27  ;;  %480 = vadd.xlane.f32.xlu2 %v479_v11 }
 0x11f   : > { %v448_v47 = vpop.xlane.xlu0 %447 }
 0x120   : > { %v442_v28 = vpop.xlane.xlu1 %441  ;;  %v2127_v45 = vmul.f32 %v448_v47, %v1945_v54 }
 0x121   : > { %v2124_v48 = vmul.f32 %v442_v28, %v1945_v54 }
 0x122   : > { %vm535_vm5 = vcmp.eq.f32.partialorder %v2127_v45, inf  ;;  %vm537_vm6 = vcmp.eq.f32.partialorder %v2127_v45, 0.0 }
 0x123   : > { %1426 = vrsqrt.f32 %v2124_v48  ;;  %vm511_vm3 = vcmp.eq.f32.partialorder %v2124_v48, inf  ;;  %vm513_vm4 = vcmp.eq.f32.partialorder %v2124_v48, 0.0 }
 0x124   : > { %1428 = vrsqrt.f32 %v2127_v45 }
 0x127   : > { %v457_v56 = vpop.xlane.xlu0 %456 }
 0x128   : > { %v451_v30 = vpop.xlane.xlu1 %450  ;;  %v445_v55 = vpop.xlane.xlu2 %444  ;;  %v2147_v15 = vmul.f32 %v457_v56, %v1945_v54 }
 0x129   : > { %v1427_v49 = vpop.eup %1426  ;;  %v2132_v53 = vmul.f32 %v451_v30, %v1945_v54  ;;  %v2136_v0 = vmul.f32 %v445_v55, %v1945_v54 }
 0x12a   : > { %v1429_v57 = vpop.eup %1428  ;;  %v505_v31 = vmul.f32 %v1427_v49, %v2124_v48  ;;  %vm571_vm12 = vcmp.eq.f32.partialorder %v2147_v15, inf  ;;  %vm573_vm14 = vcmp.eq.f32.partialorder %v2147_v15, 0.0 }
 0x12b   : > { %v529_v18 = vmul.f32 %v1429_v57, %v2127_v45  ;;  %1430 = vrsqrt.f32 %v2132_v53  ;;  %vm547_vm7 = vcmp.eq.f32.partialorder %v2132_v53, inf  ;;  %vm549_vm9 = vcmp.eq.f32.partialorder %v2132_v53, 0.0 }
 0x12c   : > { %v506_v37 = vmul.f32 %v1427_v49, %v505_v31  ;;  %1432 = vrsqrt.f32 %v2136_v0  ;;  %vm523_vm10 = vcmp.eq.f32.partialorder %v2136_v0, inf  ;;  %vm525_vm11 = vcmp.eq.f32.partialorder %v2136_v0, 0.0 }
 0x12d   : > { %v530_v17 = vmul.f32 %v1429_v57, %v529_v18  ;;  %1434 = vrsqrt.f32 %v2147_v15  ;;  %v514_v18 = vand.u32 2147483648, %v2124_v48 }
 0x12e   : > { %v507_v24 = vmul.f32 0.5, %v506_v37 }
 0x12f   : > { %v531_v25 = vmul.f32 0.5, %v530_v17 }
 0x130   : > { %v508_v10 = vsub.f32 1.5, %v507_v24  ;;  %v454_v46 = vpop.xlane.xlu2 %453 }
 0x131   : > { %v1431_v11 = vpop.eup %1430  ;;  %v532_v47 = vsub.f32 1.5, %v531_v25  ;;  %v2171_v56 = vmul.f32 %v454_v46, %v1945_v54 }
 0x132   : > { %v509_v30 = vmul.f32 %v1427_v49, %v508_v10  ;;  %v541_v55 = vmul.f32 %v1431_v11, %v2132_v53  ;;  %v1433_v31 = vpop.eup %1432  ;;  %v970_v49 = vsel %vm943_vm2, %v2153_v5, %v2144_v36  ;;  %v945_v10 = vrot.slane %v944_v50, 1 }
 0x133   : > { %v533_v37 = vmul.f32 %v1429_v57, %v532_v47  ;;  %v517_v25 = vmul.f32 %v1433_v31, %v2136_v0  ;;  %1436 = vrsqrt.f32 %v2171_v56  ;;  %v2184_v28 = vpop.eup %1434  ;;  %v538_v47 = vand.u32 2147483648, %v2127_v45 }
 0x134   : > { %v510_v17 = vmul.f32 %v509_v30, %v2124_v48  ;;  %v542_v24 = vmul.f32 %v1431_v11, %v541_v55  ;;  %v971_v50 = vrot.slane %v970_v49, 1  ;;  %v2198_v38 = vperm.slane %v945_v10, 0 }
 0x135   : > { %v534_v46 = vmul.f32 %v533_v37, %v2127_v45  ;;  %v518_v27 = vmul.f32 %v1433_v31, %v517_v25 }
 0x136   : > { %v512_v57 = vsel %vm511_vm3, %v2124_v48, %v510_v17  ;;  %v543_v30 = vmul.f32 0.5, %v542_v24  ;;  %v460_v17 = vpop.xlane.xlu1 %459  ;;  %v565_v48 = vmul.f32 %v2184_v28, %v2147_v15  ;;  %v2213_v25 = vperm.slane %v971_v50, 1 }
 0x137   : > { %v515_v55 = vsel %vm513_vm4, %v514_v18, %v512_v57  ;;  %v536_v37 = vsel %vm535_vm5, %v2127_v45, %v534_v46  ;;  %v519_v40 = vmul.f32 0.5, %v518_v27  ;;  %v2205_v18 = vperm.slane %v945_v10, 1  ;;  %v466_v46 = vpop.xlane.xlu0 %465 }
 0x138   : > { %v2196_v9 = vadd.f32 1e-06, %v515_v55  ;;  %v539_v44 = vsel %vm537_vm6, %v538_v47, %v536_v37  ;;  %v544_v41 = vsub.f32 1.5, %v543_v30  ;;  %v550_v45 = vand.u32 2147483648, %v2132_v53 }
 0x139   : > { %v2200_v24 = vadd.f32 1e-06, %v539_v44  ;;  %v2209_v49 = vpop.eup %1436  ;;  %v2211_v27 = vperm.slane %v971_v50, 0  ;;  %v2217_v44 = vmul.f32 %v460_v17, %v1945_v54  ;;  %v520_v47 = vsub.f32 1.5, %v519_v40 }
 0x13a   : > { %1438 = vrcp.f32 %v2196_v9  ;;  %v545_v57 = vmul.f32 %v1431_v11, %v544_v41  ;;  %v2223_v10 = vsel %vm946_vm8, %v2142_v20, %v2138_v8  ;;  %v526_v30 = vand.u32 2147483648, %v2136_v0 }
 0x13b   : > { %1440 = vrcp.f32 %v2200_v24  ;;  %v566_v55 = vmul.f32 %v2184_v28, %v565_v48  ;;  %v574_v50 = vand.u32 2147483648, %v2147_v15  ;;  %v521_v17 = vmul.f32 %v1433_v31, %v520_v47 }
 0x13c   : > { %v546_v37 = vmul.f32 %v545_v57, %v2132_v53  ;;  %v553_v40 = vmul.f32 %v2209_v49, %v2171_v56  ;;  %v2233_v41 = vmul.f32 %v466_v46, %v1945_v54  ;;  %1442 = vrsqrt.f32 %v2217_v44 }
 0x13d   : > { %v567_v32 = vmul.f32 0.5, %v566_v55  ;;  %vm717_vm13 = vweird.f32 %v2196_v9  ;;  %v522_v46 = vmul.f32 %v521_v17, %v2136_v0  ;;  %v721_v11 = vand.u32 2147483647, %v2196_v9 }
 0x13e   : > { %v548_v31 = vsel %vm547_vm7, %v2132_v53, %v546_v37  ;;  %v554_v57 = vmul.f32 %v2209_v49, %v553_v40  ;;  %v723_v19 = vand.u32 2147483648, %v2196_v9  ;;  %vm745_vm0 = vweird.f32 %v2200_v24 }
 0x13f   : > { %v551_v7 = vsel %vm549_vm9, %v550_v45, %v548_v31  ;;  %v568_v2 = vsub.f32 1.5, %v567_v32  ;;  %v524_v17 = vsel %vm523_vm10, %v2136_v0, %v522_v46  ;;  %v749_v32 = vand.u32 2147483647, %v2200_v24 }
 0x140   : > { %v1439_v48 = vpop.eup %1438  ;;  %v2256_v37 = vadd.f32 1e-06, %v551_v7  ;;  %v527_v14 = vsel %vm525_vm11, %v526_v30, %v524_v17  ;;  %v555_v22 = vmul.f32 0.5, %v554_v57  ;;  %v751_v45 = vand.u32 2147483648, %v2200_v24 }
 0x141   : > { %v1441_v47 = vpop.eup %1440  ;;  %v713_v55 = vmul.f32 %v1439_v48, %v2196_v9  ;;  %v569_v23 = vmul.f32 %v2184_v28, %v568_v2  ;;  %vm718_vm15 = vweird.f32 %v1439_v48  ;;  %v2269_v13 = vadd.f32 1e-06, %v527_v14 }
 0x142   : > { %v741_v29 = vmul.f32 %v1441_v47, %v2200_v24  ;;  %1444 = vrcp.f32 %v2256_v37  ;;  %v2267_v7 = vpop.eup %1442  ;;  %vm746_vm1 = vweird.f32 %v1441_v47  ;;  %v556_v2 = vsub.f32 1.5, %v555_v22  ;;  %vm719_vm3 = vmor %vm717_vm13, %vm718_vm15 }
 0x143   : > { %v714_v40 = vsub.f32 1.0, %v713_v55  ;;  %v570_v46 = vmul.f32 %v569_v23, %v2147_v15  ;;  %vm2273_vm2 = vcmp.eq.f32.partialorder %v721_v11, 8.507059e+37  ;;  %v724_v30 = vor.u32 1.1754944e-38, %v723_v19  ;;  %vm747_vm6 = vmor %vm745_vm0, %vm746_vm1 }
 0x144   : > { %v742_v53 = vsub.f32 1.0, %v741_v29  ;;  %1446 = vrcp.f32 %v2269_v13  ;;  %vm2280_vm4 = vcmp.eq.f32.partialorder %v749_v32, 8.507059e+37  ;;  %v752_v23 = vor.u32 1.1754944e-38, %v751_v45 }
 0x145   : > { %v715_v31 = vmul.f32 %v1439_v48, %v714_v40  ;;  %v572_v22 = vsel %vm571_vm12, %v2147_v15, %v570_v46  ;;  %vm559_vm5 = vcmp.eq.f32.partialorder %v2171_v56, inf  ;;  %v973_v19 = vrot.slane %v2239_v16, 2 }
 0x146   : > { %v743_v0 = vmul.f32 %v1441_v47, %v742_v53  ;;  %v575_v9 = vsel %vm573_vm14, %v574_v50, %v572_v22  ;;  %v557_v11 = vmul.f32 %v2209_v49, %v556_v2  ;;  %vm561_vm7 = vcmp.eq.f32.partialorder %v2171_v56, 0.0 }
 0x147   : > { %v716_v29 = vadd.f32 %v1439_v48, %v715_v31  ;;  %v763_v53 = vand.u32 2147483647, %v2256_v37  ;;  %v562_v32 = vand.u32 2147483648, %v2171_v56  ;;  %v765_v46 = vand.u32 2147483648, %v2256_v37 }
 0x148   : > { %v744_v14 = vadd.f32 %v1441_v47, %v743_v0  ;;  %v1445_v55 = vpop.eup %1444  ;;  %v2808_v2 = vperm.slane %v2151_v39, 0  ;;  %v2810_v57 = vperm.slane %v2158_v6, 0  ;;  %v2811_v22 = vperm.slane %v2158_v6, 1 }
 0x149   : > { %v720_v24 = vsel %vm719_vm3, %v1439_v48, %v716_v29  ;;  %v755_v49 = vmul.f32 %v1445_v55, %v2256_v37  ;;  %vm760_vm8 = vweird.f32 %v1445_v55  ;;  %vm759_vm9 = vweird.f32 %v2256_v37 }
 0x14a   : > { %v725_v17 = vsel %vm2273_vm2, %v724_v30, %v720_v24  ;;  %v748_v40 = vsel %vm747_vm6, %v1441_v47, %v744_v14  ;;  %v2305_v47 = vadd.f32 1e-06, %v575_v9  ;;  %v1447_v0 = vpop.eup %1446  ;;  %v558_v30 = vmul.f32 %v557_v11, %v2171_v56  ;;  %vm761_vm10 = vmor %vm759_vm9, %vm760_vm8 }
 0x14b   : > { %v984_v48 = vmul.f32 %v725_v17, %v1956_v62  ;;  %v985_v45 = vmul.f32 %v725_v17, %v1959_v63  ;;  %v753_v15 = vsel %vm2280_vm4, %v752_v23, %v748_v40  ;;  %v2809_v62 = vperm.slane %v2151_v39, 1 }
 0x14c   : > { %v988_v50 = vmul.f32 %v753_v15, %v1950_v60  ;;  %v989_v31 = vmul.f32 %v753_v15, %v1953_v61  ;;  %v756_v28 = vsub.f32 1.0, %v755_v49  ;;  %v727_v61 = vmul.f32 %v1447_v0, %v2269_v13 }
 0x14d   : > { %v1048_v29 = vmul.f32 %v2808_v2, %v984_v48  ;;  %v1049_v63 = vmul.f32 %v2809_v62, %v985_v45  ;;  %1448 = vrcp.f32 %v2305_v47  ;;  %v766_v45 = vor.u32 1.1754944e-38, %v765_v46 }
 0x14e   : > { %v1052_v14 = vmul.f32 %v2198_v38, %v988_v50  ;;  %v1053_v60 = vmul.f32 %v2205_v18, %v989_v31  ;;  %v757_v9 = vmul.f32 %v1445_v55, %v756_v28  ;;  %v728_v40 = vsub.f32 1.0, %v727_v61 }
 0x14f   : > { %v1112_v23 = vadd.f32 %v2810_v57, %v1048_v29  ;;  %v1113_v24 = vadd.f32 %v2811_v22, %v1049_v63  ;;  %v737_v15 = vand.u32 2147483648, %v2269_v13  ;;  %v560_v49 = vsel %vm559_vm5, %v2171_v56, %v558_v30 }
 0x150   : > { %v1116_v17 = vadd.f32 %v2211_v27, %v1052_v14  ;;  %v1117_v11 = vadd.f32 %v2213_v25, %v1053_v60  ;;  %v758_v48 = vadd.f32 %v1445_v55, %v757_v9  ;;  %v729_v37 = vmul.f32 %v1447_v0, %v728_v40 }
 0x151   : > { %1144 = vst [vmem:[%s2325_s1] sm:$0xff] %v1112_v23  ;;  %vm732_vm11 = vweird.f32 %v1447_v0  ;;  %v735_v50 = vand.u32 2147483647, %v2269_v13  ;;  %v563_v31 = vsel %vm561_vm7, %v562_v32, %v560_v49  ;;  %vm764_vm12 = vcmp.eq.f32.partialorder %v763_v53, 8.507059e+37 }
 0x152   : > { %1145 = vst [vmem:[%s2325_s1 + $0x8] sm:$0xff] %v1113_v24  ;;  %v762_v2 = vsel %vm761_vm10, %v1445_v55, %v758_v48  ;;  %v2812_v46 = vrot.slane %v2223_v10, 2  ;;  %v2342_v62 = vadd.f32 1e-06, %v563_v31  ;;  %v730_v28 = vadd.f32 %v1447_v0, %v729_v37 }
 0x153   : > { %1148 = vst [vmem:[%s2325_s1 + $0x20] sm:$0xff] %v1116_v17  ;;  %v767_v63 = vsel %vm764_vm12, %v766_v45, %v762_v2  ;;  %vm731_vm13 = vweird.f32 %v2269_v13  ;;  %v1449_v56 = vpop.eup %1448  ;;  %v738_v53 = vor.u32 1.1754944e-38, %v737_v15  ;;  %vm736_vm15 = vcmp.eq.f32.partialorder %v735_v50, 8.507059e+37 }
 0x154   : > { %v2340_v29 = vperm.slane %v2812_v46, 0  ;;  %1149 = vst [vmem:[%s2325_s1 + $0x28] sm:$0xff] %v1117_v11  ;;  %v2813_v30 = vmov %v2812_v46  ;;  %v990_v32 = vmul.f32 %v767_v63, %v1979_v34  ;;  %v991_v55 = vmul.f32 %v767_v63, %v1982_v35  ;;  %vm733_vm14 = vmor %vm731_vm13, %vm732_vm11 }
 0x155   : > { %v2348_v14 = vperm.slane %v2813_v30, 1  ;;  %1450 = vrcp.f32 %v2342_v62  ;;  %v734_v60 = vsel %vm733_vm14, %v1447_v0, %v730_v28  ;;  %v2356_v61 = vperm.slane %v973_v19, 0 }
 0x156   : > { %v783_v13 = vmul.f32 %v1449_v56, %v2305_v47  ;;  %v1054_v10 = vmul.f32 %v2198_v38, %v990_v32  ;;  %v1055_v57 = vmul.f32 %v2205_v18, %v991_v55  ;;  %v739_v34 = vsel %vm736_vm15, %v738_v53, %v734_v60  ;;  %v463_v55 = vpop.xlane.xlu2 %462 }
 0x157   : > { %v577_v35 = vmul.f32 %v2267_v7, %v2217_v44  ;;  %v986_v23 = vmul.f32 %v739_v34, %v1985_v42  ;;  %v987_v0 = vmul.f32 %v739_v34, %v1988_v43  ;;  %vm949_vm0 = vcmask 1043459  }
 0x158   : > { %v784_v22 = vsub.f32 1.0, %v783_v13  ;;  %v1118_v24 = vadd.f32 %v2211_v27, %v1054_v10  ;;  %v1119_v9 = vadd.f32 %v2213_v25, %v1055_v57  ;;  %v791_v38 = vand.u32 2147483647, %v2305_v47  ;;  %v469_v10 = vpop.xlane.xlu1 %468 }
 0x159   : > { %v793_v18 = vand.u32 2147483648, %v2305_v47  ;;  %v2814_v17 = vperm.slane %v2151_v39, 0  ;;  %v2815_v40 = vperm.slane %v2151_v39, 1  ;;  %vm788_vm1 = vweird.f32 %v1449_v56 }
 0x15a   : > { %v785_v42 = vmul.f32 %v1449_v56, %v784_v22  ;;  %1150 = vst [vmem:[%s2325_s1 + $0x30] sm:$0xff] %v1118_v24  ;;  %vm787_vm2 = vweird.f32 %v2305_v47  ;;  %v2378_v27 = vsel %vm949_vm0, %v2142_v20, %v2138_v8  ;;  %v578_v25 = vmul.f32 %v2267_v7, %v577_v35 }
 0x15b   : > { %v1050_v11 = vmul.f32 %v2814_v17, %v986_v23  ;;  %v1051_v48 = vmul.f32 %v2815_v40, %v987_v0  ;;  %v1451_v43 = vpop.eup %1450  ;;  %1452 = vrsqrt.f32 %v2233_v41  ;;  %1151 = vst [vmem:[%s2325_s1 + $0x38] sm:$0xff] %v1119_v9  ;;  %v2816_v39 = vperm.slane %v2158_v6, 0  ;;  %vm789_vm4 = vmor %vm787_vm2, %vm788_vm1 }
 0x15c   : > { %v2817_v15 = vperm.slane %v2158_v6, 1  ;;  %v786_v37 = vadd.f32 %v1449_v56, %v785_v42  ;;  %v769_v47 = vmul.f32 %v1451_v43, %v2342_v62  ;;  %vm583_vm3 = vcmp.eq.f32.partialorder %v2217_v44, inf }
 0x15d   : > { %v1114_v45 = vadd.f32 %v2816_v39, %v1050_v11  ;;  %v1085_v50 = vperm.slane %v973_v19, 1  ;;  %v794_v31 = vor.u32 1.1754944e-38, %v793_v18  ;;  %v777_v2 = vand.u32 2147483647, %v2342_v62 }
 0x15e   : > { %v1115_v49 = vadd.f32 %v2817_v15, %v1051_v48  ;;  %v579_v46 = vmul.f32 0.5, %v578_v25  ;;  %vm585_vm5 = vcmp.eq.f32.partialorder %v2217_v44, 0.0  ;;  %v790_v63 = vsel %vm789_vm4, %v1449_v56, %v786_v37  ;;  %v472_v37 = vpop.xlane.xlu2 %471 }
 0x15f   : > { %1146 = vst [vmem:[%s2325_s1 + $0x10] sm:$0xff] %v1114_v45  ;;  %vm792_vm6 = vcmp.eq.f32.partialorder %v791_v38, 8.507059e+37  ;;  %v770_v6 = vsub.f32 1.0, %v769_v47  ;;  %v586_v28 = vand.u32 2147483648, %v2217_v44  ;;  %v779_v32 = vand.u32 2147483648, %v2342_v62 }
 0x160   : > { %1147 = vst [vmem:[%s2325_s1 + $0x18] sm:$0xff] %v1115_v49  ;;  %v795_v30 = vsel %vm792_vm6, %v794_v31, %v790_v63  ;;  %v951_v16 = vrot.slane %v2378_v27, 3  ;;  %v580_v19 = vsub.f32 1.5, %v579_v46  ;;  %vm774_vm7 = vweird.f32 %v1451_v43  ;;  %v475_v49 = vpop.xlane.xlu0 %474 }
 0x161   : > { %v994_v53 = vmul.f32 %v795_v30, %v1973_v26  ;;  %v995_v60 = vmul.f32 %v795_v30, %v1976_v33  ;;  %v771_v13 = vmul.f32 %v1451_v43, %v770_v6  ;;  %v1453_v56 = vpop.eup %1452  ;;  %vm773_vm8 = vweird.f32 %v2342_v62 }
 0x162   : > { %vm2401_vm9 = vcmp.eq.f32.partialorder %v777_v2, 8.507059e+37  ;;  %v974_v34 = vsel %vm949_vm0, %v2153_v5, %v2144_v36  ;;  %v581_v35 = vmul.f32 %v2267_v7, %v580_v19  ;;  %v601_v0 = vmul.f32 %v1453_v56, %v2233_v41  ;;  %vm775_vm10 = vmor %vm773_vm8, %vm774_vm7 }
 0x163   : > { %v1058_v26 = vmul.f32 %v2340_v29, %v994_v53  ;;  %v1059_v33 = vmul.f32 %v2348_v14, %v995_v60  ;;  %v772_v23 = vadd.f32 %v1451_v43, %v771_v13  ;;  %v780_v62 = vor.u32 1.1754944e-38, %v779_v32 }
 0x164   : > { %v582_v22 = vmul.f32 %v581_v35, %v2217_v44  ;;  %v2414_v24 = vmul.f32 %v463_v55, %v1945_v54  ;;  %v2417_v9 = vmul.f32 %v469_v10, %v1945_v54  ;;  %v602_v17 = vmul.f32 %v1453_v56, %v601_v0 }
 0x165   : > { %v1122_v7 = vadd.f32 %v2356_v61, %v1058_v26  ;;  %v1123_v38 = vadd.f32 %v1085_v50, %v1059_v33  ;;  %v776_v18 = vsel %vm775_vm10, %v1451_v43, %v772_v23  ;;  %vm952_vm11 = vcmask 1044484  }
 0x166   : > { %v781_v11 = vsel %vm2401_vm9, %v780_v62, %v776_v18  ;;  %v584_v40 = vsel %vm583_vm3, %v2217_v44, %v582_v22  ;;  %1454 = vrsqrt.f32 %v2414_v24  ;;  %v603_v43 = vmul.f32 0.5, %v602_v17 }
 0x167   : > { %1154 = vst [vmem:[%s2325_s1 + $0x50] sm:$0xff] %v1122_v7  ;;  %v992_v48 = vmul.f32 %v781_v11, %v2004_v51  ;;  %v993_v42 = vmul.f32 %v781_v11, %v2007_v52  ;;  %v587_v27 = vsel %vm585_vm5, %v586_v28, %v584_v40  ;;  %v975_v25 = vrot.slane %v974_v34, 3 }
 0x168   : > { %1155 = vst [vmem:[%s2325_s1 + $0x58] sm:$0xff] %v1123_v38  ;;  %v2432_v39 = vadd.f32 1e-06, %v587_v27  ;;  %1456 = vrsqrt.f32 %v2417_v9  ;;  %v953_v51 = vsel %vm952_vm11, %v2142_v20, %v2138_v8  ;;  %v604_v52 = vsub.f32 1.5, %v603_v43  ;;  %v478_v38 = vpop.xlane.xlu1 %477 }
 0x169   : > { %v1056_v45 = vmul.f32 %v2340_v29, %v992_v48  ;;  %v1057_v15 = vmul.f32 %v2348_v14, %v993_v42  ;;  %v976_v44 = vsel %vm952_vm11, %v2153_v5, %v2144_v36  ;;  %v2445_v31 = vperm.slane %v951_v16, 0 }
 0x16a   : > { %1458 = vrcp.f32 %v2432_v39  ;;  %v605_v14 = vmul.f32 %v1453_v56, %v604_v52  ;;  %v2447_v46 = vperm.slane %v951_v16, 1  ;;  %v2449_v63 = vperm.slane %v975_v25, 0 }
 0x16b   : > { %v1120_v47 = vadd.f32 %v2356_v61, %v1056_v45  ;;  %v1121_v29 = vadd.f32 %v1085_v50, %v1057_v15  ;;  %v954_v6 = vrot.slane %v953_v51, 4  ;;  %v2452_v28 = vmul.f32 %v475_v49, %v1945_v54 }
 0x16c   : > { %v1455_v2 = vpop.eup %1454  ;;  %v977_v30 = vrot.slane %v976_v44, 4  ;;  %v606_v32 = vmul.f32 %v605_v14, %v2233_v41  ;;  %v2458_v61 = vmul.f32 %v472_v37, %v1945_v54  ;;  %v2461_v55 = vperm.slane %v975_v25, 1 }
 0x16d   : > { %1152 = vst [vmem:[%s2325_s1 + $0x40] sm:$0xff] %v1120_v47  ;;  %v589_v19 = vmul.f32 %v1455_v2, %v2414_v24  ;;  %vm607_vm12 = vcmp.eq.f32.partialorder %v2233_v41, inf  ;;  %v610_v16 = vand.u32 2147483648, %v2233_v41  ;;  %1460 = vrsqrt.f32 %v2452_v28 }
 0x16e   : > { %v1457_v50 = vpop.eup %1456  ;;  %1153 = vst [vmem:[%s2325_s1 + $0x48] sm:$0xff] %v1121_v29  ;;  %v608_v53 = vsel %vm607_vm12, %v2233_v41, %v606_v32  ;;  %vm609_vm13 = vcmp.eq.f32.partialorder %v2233_v41, 0.0  ;;  %v2469_v56 = vperm.slane %v954_v6, 0  ;;  %v2471_v57 = vperm.slane %v954_v6, 1 }
 0x16f   : > { %v590_v60 = vmul.f32 %v1455_v2, %v589_v19  ;;  %v613_v13 = vmul.f32 %v1457_v50, %v2417_v9  ;;  %v611_v34 = vsel %vm609_vm13, %v610_v16, %v608_v53  ;;  %1462 = vrsqrt.f32 %v2458_v61 }
 0x170   : > { %v1459_v10 = vpop.eup %1458  ;;  %v2475_v26 = vperm.slane %v977_v30, 0  ;;  %v2477_v33 = vadd.f32 1e-06, %v611_v34  ;;  %v2479_v0 = vperm.slane %v977_v30, 1  ;;  %vm595_vm14 = vcmp.eq.f32.partialorder %v2414_v24, inf }
 0x171   : > { %v797_v35 = vmul.f32 %v1459_v10, %v2432_v39  ;;  %v591_v23 = vmul.f32 0.5, %v590_v60  ;;  %vm597_vm15 = vcmp.eq.f32.partialorder %v2414_v24, 0.0  ;;  %v614_v41 = vmul.f32 %v1457_v50, %v613_v13 }
 0x172   : > { %v805_v22 = vand.u32 2147483647, %v2432_v39  ;;  %1464 = vrcp.f32 %v2477_v33  ;;  %v598_v7 = vand.u32 2147483648, %v2414_v24  ;;  %v807_v17 = vand.u32 2147483648, %v2432_v39 }
 0x173   : > { %v798_v62 = vsub.f32 1.0, %v797_v35  ;;  %v1461_v18 = vpop.eup %1460  ;;  %v592_v11 = vsub.f32 1.5, %v591_v23  ;;  %v615_v40 = vmul.f32 0.5, %v614_v41  ;;  %vm619_vm0 = vcmp.eq.f32.partialorder %v2417_v9, inf }
 0x174   : > { %vm801_vm1 = vweird.f32 %v2432_v39  ;;  %vm802_vm2 = vweird.f32 %v1459_v10  ;;  %v637_v42 = vmul.f32 %v1461_v18, %v2452_v28  ;;  %vm955_vm3 = vcmask 1045509  }
 0x175   : > { %v799_v48 = vmul.f32 %v1459_v10, %v798_v62  ;;  %v2490_v27 = vpop.eup %1462  ;;  %v593_v43 = vmul.f32 %v1455_v2, %v592_v11  ;;  %v616_v25 = vsub.f32 1.5, %v615_v40  ;;  %v2493_v45 = vmul.f32 %v478_v38, %v1945_v54  ;;  %vm803_vm6 = vmor %vm801_vm1, %vm802_vm2 }
 0x176   : > { %vm806_vm4 = vcmp.eq.f32.partialorder %v805_v22, 8.507059e+37  ;;  %vm621_vm5 = vcmp.eq.f32.partialorder %v2417_v9, 0.0  ;;  %v638_v51 = vmul.f32 %v1461_v18, %v637_v42  ;;  %v808_v52 = vor.u32 1.1754944e-38, %v807_v17 }
 0x177   : > { %v800_v15 = vadd.f32 %v1459_v10, %v799_v48  ;;  %v594_v39 = vmul.f32 %v593_v43, %v2414_v24  ;;  %v617_v49 = vmul.f32 %v1457_v50, %v616_v25  ;;  %v622_v44 = vand.u32 2147483648, %v2417_v9 }
 0x178   : > { %v1465_v37 = vpop.eup %1464  ;;  %v2501_v29 = vsel %vm955_vm3, %v2142_v20, %v2138_v8  ;;  %v639_v14 = vmul.f32 0.5, %v638_v51  ;;  %v625_v2 = vmul.f32 %v2490_v27, %v2458_v61  ;;  %1466 = vrsqrt.f32 %v2493_v45 }
 0x179   : > { %v804_v47 = vsel %vm803_vm6, %v1459_v10, %v800_v15  ;;  %v825_v30 = vmul.f32 %v1465_v37, %v2477_v33  ;;  %v596_v32 = vsel %vm595_vm14, %v2414_v24, %v594_v39  ;;  %v618_v16 = vmul.f32 %v617_v49, %v2417_v9 }
 0x17a   : > { %v809_v6 = vsel %vm806_vm4, %v808_v52, %v804_v47  ;;  %v599_v20 = vsel %vm597_vm15, %v598_v7, %v596_v32  ;;  %v835_v60 = vand.u32 2147483648, %v2477_v33  ;;  %v640_v10 = vsub.f32 1.5, %v639_v14 }
 0x17b   : > { %v996_v19 = vmul.f32 %v809_v6, %v2019_v1  ;;  %v997_v50 = vmul.f32 %v809_v6, %v2022_v3  ;;  %v826_v53 = vsub.f32 1.0, %v825_v30  ;;  %v2516_v13 = vadd.f32 1e-06, %v599_v20 }
 0x17c   : > { %vm643_vm7 = vcmp.eq.f32.partialorder %v2452_v28, inf  ;;  %v620_v1 = vsel %vm619_vm0, %v2417_v9, %v618_v16  ;;  %vm645_vm8 = vcmp.eq.f32.partialorder %v2452_v28, 0.0  ;;  %v626_v3 = vmul.f32 %v2490_v27, %v625_v2 }
 0x17d   : > { %v1060_v34 = vmul.f32 %v2445_v31, %v996_v19  ;;  %v1061_v35 = vmul.f32 %v2447_v46, %v997_v50  ;;  %v827_v24 = vmul.f32 %v1465_v37, %v826_v53  ;;  %vm830_vm9 = vweird.f32 %v1465_v37 }
 0x17e   : > { %v833_v23 = vand.u32 2147483647, %v2477_v33  ;;  %1468 = vrcp.f32 %v2516_v13  ;;  %v623_v22 = vsel %vm621_vm5, %v622_v44, %v620_v1  ;;  %v646_v7 = vand.u32 2147483648, %v2452_v28  ;;  %v2533_v38 = vpop.eup %1466 }
 0x17f   : > { %v1124_v41 = vadd.f32 %v2449_v63, %v1060_v34  ;;  %v1125_v62 = vadd.f32 %v2461_v55, %v1061_v35  ;;  %v828_v17 = vadd.f32 %v1465_v37, %v827_v24  ;;  %vm829_vm10 = vweird.f32 %v2477_v33 }
 0x180   : > { %v2536_v11 = vadd.f32 1e-06, %v623_v22  ;;  %v641_v40 = vmul.f32 %v1461_v18, %v640_v10  ;;  %vm831_vm11 = vmor %vm829_vm10, %vm830_vm9  ;;  %v836_v48 = vor.u32 1.1754944e-38, %v835_v60  ;;  %v957_v42 = vrot.slane %v2501_v29, 5 }
 0x181   : > { %1156 = vst [vmem:[%s2325_s1 + $0x60] sm:$0xff] %v1124_v41  ;;  %v627_v43 = vmul.f32 0.5, %v626_v3  ;;  %vm631_vm12 = vcmp.eq.f32.partialorder %v2458_v61, inf  ;;  %v832_v9 = vsel %vm831_vm11, %v1465_v37, %v828_v17  ;;  %vm834_vm13 = vcmp.eq.f32.partialorder %v833_v23, 8.507059e+37 }
 0x182   : > { %1157 = vst [vmem:[%s2325_s1 + $0x68] sm:$0xff] %v1125_v62  ;;  %1470 = vrcp.f32 %v2536_v11  ;;  %v978_v33 = vsel %vm955_vm3, %v2153_v5, %v2144_v36  ;;  %v837_v25 = vsel %vm834_vm13, %v836_v48, %v832_v9  ;;  %v642_v18 = vmul.f32 %v641_v40, %v2452_v28 }
 0x183   : > { %v628_v15 = vsub.f32 1.5, %v627_v43  ;;  %v649_v51 = vmul.f32 %v2533_v38, %v2493_v45  ;;  %v1000_v39 = vmul.f32 %v837_v25, %v2012_v58  ;;  %v1001_v49 = vmul.f32 %v837_v25, %v2015_v59 }
 0x184   : > { %v1469_v52 = vpop.eup %1468  ;;  %vm633_vm14 = vcmp.eq.f32.partialorder %v2458_v61, 0.0  ;;  %v634_v44 = vand.u32 2147483648, %v2458_v61  ;;  %v979_v47 = vrot.slane %v978_v33, 5  ;;  %v2554_v5 = vperm.slane %v957_v42, 0 }
 0x185   : > { %v811_v37 = vmul.f32 %v1469_v52, %v2516_v13  ;;  %v644_v29 = vsel %vm643_vm7, %v2452_v28, %v642_v18  ;;  %v1064_v14 = vmul.f32 %v2469_v56, %v1000_v39  ;;  %v1065_v2 = vmul.f32 %v2471_v57, %v1001_v49 }
 0x186   : > { %v647_v58 = vsel %vm645_vm8, %v646_v7, %v644_v29  ;;  %v629_v59 = vmul.f32 %v2490_v27, %v628_v15  ;;  %v819_v30 = vand.u32 2147483647, %v2516_v13  ;;  %v650_v19 = vmul.f32 %v2533_v38, %v649_v51 }
 0x187   : > { %v812_v6 = vsub.f32 1.0, %v811_v37  ;;  %v2565_v32 = vadd.f32 1e-06, %v647_v58  ;;  %v1128_v20 = vadd.f32 %v2475_v26, %v1064_v14  ;;  %v1129_v16 = vadd.f32 %v2479_v0, %v1065_v2 }
 0x188   : > { %v1471_v50 = vpop.eup %1470  ;;  %v821_v53 = vand.u32 2147483648, %v2516_v13  ;;  %v630_v28 = vmul.f32 %v629_v59, %v2458_v61  ;;  %vm816_vm15 = vweird.f32 %v1469_v52  ;;  %vm815_vm0 = vweird.f32 %v2516_v13 }
 0x189   : > { %v813_v60 = vmul.f32 %v1469_v52, %v812_v6  ;;  %v839_v27 = vmul.f32 %v1471_v50, %v2536_v11  ;;  %1472 = vrcp.f32 %v2565_v32  ;;  %1160 = vst [vmem:[%s2325_s1 + $0x80] sm:$0xff] %v1128_v20  ;;  %v2576_v10 = vperm.slane %v957_v42, 1  ;;  %vm817_vm1 = vmor %vm815_vm0, %vm816_vm15 }
 0x18a   : > { %v2578_v34 = vperm.slane %v979_v47, 0  ;;  %v632_v35 = vsel %vm631_vm12, %v2458_v61, %v630_v28  ;;  %1161 = vst [vmem:[%s2325_s1 + $0x88] sm:$0xff] %v1129_v16  ;;  %v847_v24 = vand.u32 2147483647, %v2536_v11  ;;  %v822_v41 = vor.u32 1.1754944e-38, %v821_v53 }
 0x18b   : > { %v814_v1 = vadd.f32 %v1469_v52, %v813_v60  ;;  %v840_v3 = vsub.f32 1.0, %v839_v27  ;;  %v635_v23 = vsel %vm633_vm14, %v634_v44, %v632_v35  ;;  %v849_v13 = vand.u32 2147483648, %v2536_v11 }
 0x18c   : > { %v2588_v62 = vadd.f32 1e-06, %v635_v23  ;;  %v651_v22 = vmul.f32 0.5, %v650_v19  ;;  %vm820_vm2 = vcmp.eq.f32.partialorder %v819_v30, 8.507059e+37  ;;  %vm844_vm3 = vweird.f32 %v1471_v50 }
 0x18d   : > { %v818_v7 = vsel %vm817_vm1, %v1469_v52, %v814_v1  ;;  %v841_v17 = vmul.f32 %v1471_v50, %v840_v3  ;;  %vm843_vm4 = vweird.f32 %v2536_v11  ;;  %v2591_v48 = vperm.slane %v979_v47, 1 }
 0x18e   : > { %v823_v40 = vsel %vm820_vm2, %v822_v41, %v818_v7  ;;  %1474 = vrcp.f32 %v2588_v62  ;;  %vm848_vm5 = vcmp.eq.f32.partialorder %v847_v24, 8.507059e+37  ;;  %vm845_vm6 = vmor %vm843_vm4, %vm844_vm3  ;;  %v850_v33 = vor.u32 1.1754944e-38, %v849_v13  ;;  %v481_v13 = vpop.xlane.xlu2 %480 }
 0x18f   : > { %v1473_v61 = vpop.eup %1472  ;;  %v998_v42 = vmul.f32 %v823_v40, %v2037_v21  ;;  %v999_v43 = vmul.f32 %v823_v40, %v2040_v4  ;;  %v842_v9 = vadd.f32 %v1471_v50, %v841_v17  ;;  %vm871_vm7 = vweird.f32 %v2565_v32 }
 0x190   : > { %v867_v25 = vmul.f32 %v1473_v61, %v2565_v32  ;;  %v652_v18 = vsub.f32 1.5, %v651_v22  ;;  %v875_v52 = vand.u32 2147483647, %v2565_v32  ;;  %v877_v4 = vand.u32 2147483648, %v2565_v32  ;;  %v2822_v32 = vld [vmem:[#allocation13_spill] sm:$0xff]  ;;  %v487_v22 = vpop.xlane.xlu1 %486 }
 0x191   : > { %v1062_v11 = vmul.f32 %v2445_v31, %v998_v42  ;;  %v1063_v15 = vmul.f32 %v2447_v46, %v999_v43  ;;  %v846_v51 = vsel %vm845_vm6, %v1471_v50, %v842_v9  ;;  %v2820_v31 = vld [vmem:[#allocation14_spill] sm:$0xff]  ;;  %vm872_vm8 = vweird.f32 %v1473_v61  ;;  %v484_v50 = vpop.xlane.xlu0 %483  ;;  %v2824_v42 = vld [vmem:[#allocation16_spill] sm:$0xff] }
 0x192   : > { %v851_v21 = vsel %vm848_vm5, %v850_v33, %v846_v51  ;;  %v868_v39 = vsub.f32 1.0, %v867_v25  ;;  %v653_v49 = vmul.f32 %v2533_v38, %v652_v18  ;;  %vm655_vm9 = vcmp.eq.f32.partialorder %v2493_v45, inf  ;;  %vm873_vm11 = vmor %vm871_vm7, %vm872_vm8 }
 0x193   : > { %v1126_v44 = vadd.f32 %v2449_v63, %v1062_v11  ;;  %v1127_v37 = vadd.f32 %v2461_v55, %v1063_v15  ;;  %v1002_v47 = vmul.f32 %v851_v21, %v2056_v12  ;;  %v1003_v29 = vmul.f32 %v851_v21, %v2820_v31  ;;  %v2652_v15 = vld [vmem:[#allocation5] sm:$0xff]  ;;  %v2658_v21 = vld [vmem:[#allocation7] sm:$0xff] }
 0x194   : > { %v1475_v46 = vpop.eup %1474  ;;  %v869_v14 = vmul.f32 %v1473_v61, %v868_v39  ;;  %v654_v2 = vmul.f32 %v653_v49, %v2493_v45  ;;  %v658_v55 = vand.u32 2147483648, %v2493_v45  ;;  %v878_v59 = vor.u32 1.1754944e-38, %v877_v4 }
 0x195   : > { %1158 = vst [vmem:[%s2325_s1 + $0x70] sm:$0xff] %v1126_v44  ;;  %v1066_v58 = vmul.f32 %v2469_v56, %v1002_v47  ;;  %v1067_v38 = vmul.f32 %v2471_v57, %v1003_v29  ;;  %v853_v63 = vmul.f32 %v1475_v46, %v2588_v62  ;;  %vm657_vm10 = vcmp.eq.f32.partialorder %v2493_v45, 0.0 }
 0x196   : > { %1159 = vst [vmem:[%s2325_s1 + $0x78] sm:$0xff] %v1127_v37  ;;  %v870_v12 = vadd.f32 %v1473_v61, %v869_v14  ;;  %v656_v6 = vsel %vm655_vm9, %v2493_v45, %v654_v2  ;;  %vm876_vm12 = vcmp.eq.f32.partialorder %v875_v52, 8.507059e+37  ;;  %v863_v16 = vand.u32 2147483648, %v2588_v62 }
 0x197   : > { %v1130_v30 = vadd.f32 %v2475_v26, %v1066_v58  ;;  %v1131_v19 = vadd.f32 %v2479_v0, %v1067_v38  ;;  %v854_v56 = vsub.f32 1.0, %v853_v63  ;;  %v659_v57 = vsel %vm657_vm10, %v658_v55, %v656_v6  ;;  %v2821_v0 = vld [vmem:[#allocation12_spill] sm:$0xff] }
 0x198   : > { %v874_v20 = vsel %vm873_vm11, %v1473_v61, %v870_v12  ;;  %v2623_v53 = vadd.f32 1e-06, %v659_v57  ;;  %vm858_vm13 = vweird.f32 %v1475_v46  ;;  %v861_v26 = vand.u32 2147483647, %v2588_v62 }
 0x199   : > { %1162 = vst [vmem:[%s2325_s1 + $0x90] sm:$0xff] %v1130_v30  ;;  %v879_v45 = vsel %vm876_vm12, %v878_v59, %v874_v20  ;;  %v855_v28 = vmul.f32 %v1475_v46, %v854_v56  ;;  %v2632_v35 = vmul.f32 %v484_v50, %v1945_v54  ;;  %vm857_vm14 = vweird.f32 %v2588_v62  ;;  %v2823_v62 = vld [vmem:[#allocation15_spill] sm:$0xff]  ;;  %v2826_v50 = vld [vmem:[#allocation20_spill] sm:$0xff] }
 0x19a   : > { %1163 = vst [vmem:[%s2325_s1 + $0x98] sm:$0xff] %v1131_v19  ;;  %v1006_v60 = vmul.f32 %v879_v45, %v2821_v0  ;;  %v1007_v27 = vmul.f32 %v879_v45, %v2822_v32  ;;  %1476 = vrcp.f32 %v2623_v53  ;;  %vm859_vm15 = vmor %vm857_vm14, %vm858_vm13  ;;  %v864_v23 = vor.u32 1.1754944e-38, %v863_v16  ;;  %v2825_v56 = vld [vmem:[#allocation19_spill] sm:$0xff] }
 0x19b   : > { %v856_v1 = vadd.f32 %v1475_v46, %v855_v28  ;;  %vm862_vm0 = vcmp.eq.f32.partialorder %v861_v26, 8.507059e+37  ;;  %vm958_vm1 = vcmask 1046534   ;;  %1478 = vrsqrt.f32 %v2632_v35 }
 0x19c   : > { %v1070_v3 = vmul.f32 %v2554_v5, %v1006_v60  ;;  %v1071_v24 = vmul.f32 %v2576_v10, %v1007_v27  ;;  %v2644_v33 = vmul.f32 %v481_v13, %v1945_v54  ;;  %v2647_v25 = vmul.f32 %v487_v22, %v1945_v54 }
 0x19d   : > { %v860_v41 = vsel %vm859_vm15, %v1475_v46, %v856_v1  ;;  %v959_v51 = vsel %vm958_vm1, %v2652_v15, %v2138_v8  ;;  %v980_v54 = vsel %vm958_vm1, %v2658_v21, %v2144_v36  ;;  %v891_v44 = vand.u32 2147483648, %v2623_v53 }
 0x19e   : > { %v1134_v7 = vadd.f32 %v2578_v34, %v1070_v3  ;;  %v1135_v17 = vadd.f32 %v2591_v48, %v1071_v24  ;;  %v865_v40 = vsel %vm862_vm0, %v864_v23, %v860_v41  ;;  %1480 = vrsqrt.f32 %v2644_v33 }
 0x19f   : > { %v1004_v61 = vmul.f32 %v865_v40, %v2823_v62  ;;  %v1005_v43 = vmul.f32 %v865_v40, %v2824_v42  ;;  %1482 = vrsqrt.f32 %v2647_v25  ;;  %v960_v49 = vrot.slane %v959_v51, 6 }
 0x1a0   : > { %v1477_v9 = vpop.eup %1476  ;;  %1166 = vst [vmem:[%s2325_s1 + $0xb0] sm:$0xff] %v1134_v7  ;;  %v889_v47 = vand.u32 2147483647, %v2623_v53  ;;  %v981_v29 = vrot.slane %v980_v54, 6  ;;  %vm885_vm3 = vweird.f32 %v2623_v53  ;;  %v892_v58 = vor.u32 1.1754944e-38, %v891_v44 }
 0x1a1   : > { %1167 = vst [vmem:[%s2325_s1 + $0xb8] sm:$0xff] %v1135_v17  ;;  %v1068_v18 = vmul.f32 %v2554_v5, %v1004_v61  ;;  %v1069_v11 = vmul.f32 %v2576_v10, %v1005_v43  ;;  %v881_v52 = vmul.f32 %v1477_v9, %v2623_v53  ;;  %v1479_v4 = vpop.eup %1478  ;;  %vm886_vm2 = vweird.f32 %v1477_v9 }
 0x1a2   : > { %v673_v31 = vmul.f32 %v1479_v4, %v2632_v35  ;;  %v2673_v14 = vperm.slane %v960_v49, 0  ;;  %v2675_v2 = vperm.slane %v960_v49, 1  ;;  %vm887_vm4 = vmor %vm885_vm3, %vm886_vm2  ;;  %vm890_vm5 = vcmp.eq.f32.partialorder %v889_v47, 8.507059e+37 }
 0x1a3   : > { %v1132_v5 = vadd.f32 %v2578_v34, %v1068_v18  ;;  %v1133_v10 = vadd.f32 %v2591_v48, %v1069_v11  ;;  %v882_v39 = vsub.f32 1.0, %v881_v52  ;;  %v2678_v59 = vperm.slane %v981_v29, 0 }
 0x1a4   : > { %v674_v34 = vmul.f32 %v1479_v4, %v673_v31  ;;  %v1481_v48 = vpop.eup %1480  ;;  %v2680_v6 = vperm.slane %v981_v29, 1  ;;  %vm679_vm6 = vcmp.eq.f32.partialorder %v2632_v35, inf  ;;  %v682_v23 = vand.u32 2147483648, %v2632_v35 }
 0x1a5   : > { %1164 = vst [vmem:[%s2325_s1 + $0xa0] sm:$0xff] %v1132_v5  ;;  %v883_v37 = vmul.f32 %v1477_v9, %v882_v39  ;;  %v1483_v38 = vpop.eup %1482  ;;  %v661_v12 = vmul.f32 %v1481_v48, %v2644_v33  ;;  %vm681_vm7 = vcmp.eq.f32.partialorder %v2632_v35, 0.0  ;;  %vm667_vm8 = vcmp.eq.f32.partialorder %v2644_v33, inf }
 0x1a6   : > { %1165 = vst [vmem:[%s2325_s1 + $0xa8] sm:$0xff] %v1133_v10  ;;  %v675_v55 = vmul.f32 0.5, %v674_v34  ;;  %v685_v19 = vmul.f32 %v1483_v38, %v2647_v25  ;;  %v670_v42 = vand.u32 2147483648, %v2644_v33  ;;  %vm691_vm9 = vcmp.eq.f32.partialorder %v2647_v25, inf }
 0x1a7   : > { %v884_v46 = vadd.f32 %v1477_v9, %v883_v37  ;;  %v662_v53 = vmul.f32 %v1481_v48, %v661_v12  ;;  %v694_v43 = vand.u32 2147483648, %v2647_v25  ;;  %vm669_vm10 = vcmp.eq.f32.partialorder %v2644_v33, 0.0 }
 0x1a8   : > { %v676_v16 = vsub.f32 1.5, %v675_v55  ;;  %v686_v45 = vmul.f32 %v1483_v38, %v685_v19  ;;  %vm693_vm11 = vcmp.eq.f32.partialorder %v2647_v25, 0.0  ;;  %vm961_vm12 = vcmask 1046528  }
 0x1a9   : > { %v888_v63 = vsel %vm887_vm4, %v1477_v9, %v884_v46  ;;  %v663_v60 = vmul.f32 0.5, %v662_v53  ;;  %v962_v54 = vsel %vm961_vm12, %v2138_v8, %v2652_v15  ;;  %v982_v5 = vsel %vm961_vm12, %v2144_v36, %v2658_v21 }
 0x1aa   : > { %v893_v30 = vsel %vm890_vm5, %v892_v58, %v888_v63  ;;  %v677_v0 = vmul.f32 %v1479_v4, %v676_v16  ;;  %v687_v32 = vmul.f32 0.5, %v686_v45  ;;  %v983_v4 = vrot.slane %v982_v5, 7  ;;  %v2828_v16 = vld [vmem:[#allocation18_spill] sm:$0xff] }
 0x1ab   : > { %v1008_v57 = vmul.f32 %v893_v30, %v2825_v56  ;;  %v1009_v20 = vmul.f32 %v893_v30, %v2826_v50  ;;  %v664_v24 = vsub.f32 1.5, %v663_v60  ;;  %v2827_v50 = vld [vmem:[#allocation17_spill] sm:$0xff] }
 0x1ac   : > { %v678_v3 = vmul.f32 %v677_v0, %v2632_v35  ;;  %v688_v41 = vsub.f32 1.5, %v687_v32  ;;  %v1094_v34 = vperm.slane %v983_v4, 0  ;;  %v1095_v15 = vperm.slane %v983_v4, 1 }
 0x1ad   : > { %v1072_v28 = vmul.f32 %v2673_v14, %v1008_v57  ;;  %v1073_v26 = vmul.f32 %v2675_v2, %v1009_v20  ;;  %v665_v22 = vmul.f32 %v1481_v48, %v664_v24 }
 0x1ae   : > { %v680_v13 = vsel %vm679_vm6, %v2632_v35, %v678_v3  ;;  %v689_v17 = vmul.f32 %v1483_v38, %v688_v41 }
 0x1af   : > { %v1136_v27 = vadd.f32 %v2678_v59, %v1072_v28  ;;  %v1137_v1 = vadd.f32 %v2680_v6, %v1073_v26  ;;  %v683_v7 = vsel %vm681_vm7, %v682_v23, %v680_v13  ;;  %v666_v62 = vmul.f32 %v665_v22, %v2644_v33  ;;  %v2829_v13 = vld [vmem:[#allocation21_spill] sm:$0xff] }
 0x1b0   : > { %v710_v40 = vadd.f32 1e-06, %v683_v7  ;;  %v690_v61 = vmul.f32 %v689_v17, %v2647_v25  ;;  %v2830_v7 = vld [vmem:[#allocation22_spill] sm:$0xff] }
 0x1b1   : > { %1168 = vst [vmem:[%s2325_s1 + $0xc0] sm:$0xff] %v1136_v27  ;;  %v668_v35 = vsel %vm667_vm8, %v2644_v33, %v666_v62  ;;  %v963_v33 = vrot.slane %v962_v54, 7  ;;  %v2831_v62 = vld [vmem:[#allocation23_spill] sm:$0xff] }
 0x1b2   : > { %1169 = vst [vmem:[%s2325_s1 + $0xc8] sm:$0xff] %v1137_v1  ;;  %1484 = vrcp.f32 %v710_v40  ;;  %v692_v9 = vsel %vm691_vm9, %v2647_v25, %v690_v61  ;;  %v671_v18 = vsel %vm669_vm10, %v670_v42, %v668_v35  ;;  %v917_v44 = vand.u32 2147483647, %v710_v40  ;;  %v2832_v42 = vld [vmem:[#allocation24_spill] sm:$0xff] }
 0x1b3   : > { %v695_v11 = vsel %vm693_vm11, %v694_v43, %v692_v9  ;;  %v709_v51 = vadd.f32 1e-06, %v671_v18  ;;  %v919_v25 = vand.u32 2147483648, %v710_v40  ;;  %v1030_v29 = vperm.slane %v963_v33, 0 }
 0x1b4   : > { %v711_v52 = vadd.f32 1e-06, %v695_v11  ;;  %v1031_v46 = vperm.slane %v963_v33, 1  ;;  %vm913_vm14 = vweird.f32 %v710_v40  ;;  %vm918_vm0 = vcmp.eq.f32.partialorder %v917_v44, 8.507059e+37 }
 0x1b5   : > { %1486 = vrcp.f32 %v709_v51  ;;  %v920_v21 = vor.u32 1.1754944e-38, %v919_v25  ;;  %v903_v38 = vand.u32 2147483647, %v709_v51  ;;  %v905_v55 = vand.u32 2147483648, %v709_v51 }
 0x1b6   : > { %1488 = vrcp.f32 %v711_v52  ;;  %v931_v30 = vand.u32 2147483647, %v711_v52  ;;  %v933_v57 = vand.u32 2147483648, %v711_v52  ;;  %vm899_vm3 = vweird.f32 %v709_v51 }
 0x1b7   : > { %vm927_vm4 = vweird.f32 %v711_v52  ;;  %v906_v60 = vor.u32 1.1754944e-38, %v905_v55  ;;  %vm904_vm6 = vcmp.eq.f32.partialorder %v903_v38, 8.507059e+37 }
 0x1b8   : > { %v1485_v10 = vpop.eup %1484  ;;  %vm932_vm8 = vcmp.eq.f32.partialorder %v931_v30, 8.507059e+37  ;;  %v934_v1 = vor.u32 1.1754944e-38, %v933_v57 }
 0x1b9   : > { %v909_v39 = vmul.f32 %v1485_v10, %v710_v40  ;;  %vm914_vm13 = vweird.f32 %v1485_v10 }
 0x1ba   : > { %vm915_vm15 = vmor %vm913_vm14, %vm914_vm13 }
 0x1bb   : > { %v910_v49 = vsub.f32 1.0, %v909_v39  ;;  %v1487_v37 = vpop.eup %1486 }
 0x1bc   : > { %v1489_v31 = vpop.eup %1488  ;;  %v895_v8 = vmul.f32 %v1487_v37, %v709_v51  ;;  %vm900_vm1 = vweird.f32 %v1487_v37 }
 0x1bd   : > { %v911_v47 = vmul.f32 %v1485_v10, %v910_v49  ;;  %v923_v36 = vmul.f32 %v1489_v31, %v711_v52  ;;  %vm928_vm2 = vweird.f32 %v1489_v31  ;;  %vm901_vm5 = vmor %vm899_vm3, %vm900_vm1 }
 0x1be   : > { %v896_v58 = vsub.f32 1.0, %v895_v8  ;;  %vm929_vm7 = vmor %vm927_vm4, %vm928_vm2 }
 0x1bf   : > { %v912_v48 = vadd.f32 %v1485_v10, %v911_v47  ;;  %v924_v12 = vsub.f32 1.0, %v923_v36 }
 0x1c0   : > { %v897_v56 = vmul.f32 %v1487_v37, %v896_v58 }
 0x1c1   : > { %v916_v63 = vsel %vm915_vm15, %v1485_v10, %v912_v48  ;;  %v925_v45 = vmul.f32 %v1489_v31, %v924_v12 }
 0x1c2   : > { %v921_v19 = vsel %vm918_vm0, %v920_v21, %v916_v63  ;;  %v898_v28 = vadd.f32 %v1487_v37, %v897_v56 }
 0x1c3   : > { %v1012_v20 = vmul.f32 %v921_v19, %v2827_v50  ;;  %v1013_v53 = vmul.f32 %v921_v19, %v2828_v16  ;;  %v926_v32 = vadd.f32 %v1489_v31, %v925_v45 }
 0x1c4   : > { %v902_v27 = vsel %vm901_vm5, %v1487_v37, %v898_v28 }
 0x1c5   : > { %v1076_v26 = vmul.f32 %v1030_v29, %v1012_v20  ;;  %v1077_v0 = vmul.f32 %v1031_v46, %v1013_v53  ;;  %v907_v23 = vsel %vm904_vm6, %v906_v60, %v902_v27  ;;  %v930_v41 = vsel %vm929_vm7, %v1489_v31, %v926_v32 }
 0x1c6   : > { %v1010_v22 = vmul.f32 %v907_v23, %v2829_v13  ;;  %v1011_v17 = vmul.f32 %v907_v23, %v2830_v7  ;;  %v935_v40 = vsel %vm932_vm8, %v934_v1, %v930_v41 }
 0x1c7   : > { %v1140_v3 = vadd.f32 %v1094_v34, %v1076_v26  ;;  %v1141_v24 = vadd.f32 %v1095_v15, %v1077_v0  ;;  %v1014_v61 = vmul.f32 %v935_v40, %v2831_v62  ;;  %v1015_v43 = vmul.f32 %v935_v40, %v2832_v42 }
 0x1c8   : > { %v1074_v35 = vmul.f32 %v2673_v14, %v1010_v22  ;;  %v1075_v9 = vmul.f32 %v2675_v2, %v1011_v17 }
 0x1c9   : > { %1172 = vst [vmem:[%s2325_s1 + $0xe0] sm:$0xff] %v1140_v3  ;;  %v1078_v18 = vmul.f32 %v1030_v29, %v1014_v61  ;;  %v1079_v11 = vmul.f32 %v1031_v46, %v1015_v43 }
 0x1ca   : > { %1173 = vst [vmem:[%s2325_s1 + $0xe8] sm:$0xff] %v1141_v24  ;;  %v1138_v51 = vadd.f32 %v2678_v59, %v1074_v35  ;;  %v1139_v52 = vadd.f32 %v2680_v6, %v1075_v9 }
 0x1cb   : > { %v1142_v54 = vadd.f32 %v1094_v34, %v1078_v18  ;;  %v1143_v5 = vadd.f32 %v1095_v15, %v1079_v11 }
 0x1cc   : > { %1170 = vst [vmem:[%s2325_s1 + $0xd0] sm:$0xff] %v1138_v51 }
 0x1cd   : > { %1171 = vst [vmem:[%s2325_s1 + $0xd8] sm:$0xff] %v1139_v52 }
 0x1ce   : > { %1174 = vst [vmem:[%s2325_s1 + $0xf0] sm:$0xff] %v1142_v54 }
 0x1cf   : > { %1175 = vst [vmem:[%s2325_s1 + $0xf8] sm:$0xff] %v1143_v5 }
 0x1d0   : > { %1609 = shalt.err (!%p1606_p1)
}
 0x1d1   : > { %s1675_s19 = smov 256   ;;  %s1676_s26 = smov 16  }
 0x1d2   : > { %1346 = dma.vmem_to_hbm [thread:$0]  (%p1749_p8), %s1196_s8, 4096, %s1198_s11, %s1177_s22, %s1675_s19, %s1675_s19, %s1676_s26  }
 0x1d3 PF: > { %s1212_s27 = sand.u32 1, %s1648_s12   ;;  %p1360_p2 = pnand %p1320_p13, %p1753_p9 }
 0x1d4   : > { %s1213_s20 = scalar_lea.sflag [#allocation4], %s1212_s27 }
 0x1d5   : > { %p1361_p4 = pneg %p1360_p2 }
 0x1d7   : > { %1643 = dma.done.wait (%p1361_p4), %s1213_s20, 4096  }
 0x1d8   : > { %1645 = vsyncadd (%p1361_p4), %s1213_s20, 4294963200  ;;  %s20_s17 = sadd.s32 1, %s1668_s17   ;;  %s2833_s12 = smov %s1652_s13 }
 0x1d9   : > { %p17_p6 = scmp.ge.s32.totalorder %s20_s17, 4   ;;  %s2834_s13 = smov %s1656_s14 }
 0x1da   : > { %s2835_s14 = smov %s1794_s7  ;;  %s2836_s15 = smov %s1664_s16 }
 0x1db   : > { %s2837_s16 = smov %s2839_s18  ;;  %19 = sbr.rel (!%p17_p6) target bundleno = 9 (0x9), region = 87 }
 0x1e0   :  { %1219 = vsyncpa [#allocation3], 1 }
 0x1e1   :  { %1221 = vsyncpa [#allocation3 + $0x1], 1 }
 0x1e2   :  { %1222 = vsyncpa [#allocation6], 1 }
 0x1e3   :  { %1223 = vsyncpa [#allocation4], 1 }
 0x1e4   :  { %1225 = vsyncpa [#allocation4 + $0x1], 1 }

</bundles_post_ra>
